<compile_context>
chip_gen: v5e
topology: v5e:2x2
jax: 0.10.0
libtpu: 0.0.40
codegen_flags: <defaults>
</compile_context>

<pallas_src>
import math
import numpy as np
import jax
import jax.numpy as jnp
from jax.experimental import pallas as pl
from jax.experimental.pallas import tpu as pltpu

KSIZE = 3
SCALE = 3
SOFTMAX_SCALE = 10.0
ESCAPE_NAN = 1e-4   # escape_NaN buffer


def _round_up(x, m):
    return ((x + m - 1) // m) * m


def _pick_tile_h(H, W, target_rows):
    """Largest divisor t of H with t*W a sublane multiple and t*W <= target."""
    best = H                       # full image is always a legal output block
    for t in range(1, H + 1):
        if H % t or (t * W) % 8:
            continue
        if t * W <= target_rows:
            best = t
    return best


# ----------------------------- Pallas kernel -------------------------------

def _make_csa_kernel(*, H, W, L, Lp, tile_h, C9p):
    tile_n = tile_h * W
    win_rows = (tile_h + 2) * W          # query rows h0-1 .. h0+tile_h (halo'd)
    align = tile_n & -tile_n             # true power-of-two divisor of tile_n

    def kernel(xp_ref, wmT_ref, wd_ref, edge_ref, out_ref):
        # xp_ref  : [1, (H+2)*W, K1p] bf16  query patches + zero row halo (resident)
        # wmT_ref : [1, K1p, Lp]      bf16  (10/||w||)-scaled match patches^T
        # wd_ref  : [1, 9, Lp, C9p]   bf16  assembly taps per (dh, dw)
        # edge_ref: [win_rows, 2]     f32   column-edge masks for dw=-1 / dw=+1
        # out_ref : [1, tile_n, C9p]  f32   per-query 3x3xC output blocks
        n = pl.program_id(1)
        h0 = n * tile_h
        start = pl.multiple_of(n * tile_n, align)
        xwin = xp_ref[0, pl.ds(start, win_rows), :]          # [win_rows, K1p]

        # correlation scores == softmax_scale * F.conv2d(xi, wi_normed)
        s = jnp.dot(xwin, wmT_ref[0], preferred_element_type=jnp.float32)
        if Lp > L:                                           # mask padded L lanes
            lane = jax.lax.broadcasted_iota(jnp.int32, s.shape, 1)
            s = jnp.where(lane < L, s, -1e30)
        s = s - jnp.max(s, axis=1, keepdims=True)
        e = jnp.exp(s)
        inv = pl.reciprocal(jnp.sum(e, axis=1, keepdims=True), approx=True)
        attn = e * (inv * (1.0 / 6.0))       # softmax + conv_transpose /6 folded

        # zero the attention of out-of-image halo rows (first / last W rows)
        ri = jax.lax.broadcasted_iota(jnp.int32, attn.shape, 0)
        lo = jnp.where(h0 == 0, W, 0)
        hi = jnp.where(h0 + tile_h == H, (tile_h + 1) * W, (tile_h + 2) * W)
        attn = jnp.where((ri >= lo) & (ri < hi), attn, 0.0)

        # three column-shifted copies of the attention window (dw = -1, 0, +1);
        # edge masks kill contributions that would cross an image-row boundary.
        zrow = jnp.zeros((1, Lp), jnp.float32)
        shifted = (
            jnp.concatenate([zrow, attn[:-1, :]], axis=0) * edge_ref[:, 0:1],
            attn,
            jnp.concatenate([attn[1:, :], zrow], axis=0) * edge_ref[:, 1:2],
        )

        # fused conv_transpose fold (gather form): each query's 3x3xC output
        # block = sum over its 9 neighbours of attention x assembly-patch taps.
        acc = jnp.zeros((tile_n, C9p), jnp.float32)
        for a in range(3):                 # dh = a - 1 (neighbour row offset)
            for b in range(3):             # dw = b - 1 (neighbour col offset)
                slab = shifted[b][a * W:a * W + tile_n, :].astype(jnp.bfloat16)
                acc = acc + jnp.dot(slab, wd_ref[0, 3 * a + b],
                                    preferred_element_type=jnp.float32)
        out_ref[0] = acc.astype(out_ref.dtype)

    return kernel


def cross_scale_attn_fused_pallas(xpatch, wmatch, rawp, H, W, C, tile_rows=256):
    """Fused correlation->softmax->patch assembly->conv_transpose fold.

    xpatch [B, H*W, K1] f32, wmatch [B, L, K1] f32, rawp [B, L, C*81] f32
      -> [B, C, 3H, 3W] f32
    """
    B, N, K1 = xpatch.shape
    L = wmatch.shape[1]
    assert N == H * W and rawp.shape[2] == C * 81

    # --- hoisted per-batch work (once, not per N tile) -----------------------
    # L2-normalize each matching patch over (C/2,k,k), escape NaN, and fold the
    # softmax scale into the same elementwise pass (perf review: strictly free).
    nrm = jnp.maximum(jnp.sqrt(jnp.sum(wmatch * wmatch, axis=2, keepdims=True)),
                      ESCAPE_NAN)
    wm_n = (wmatch * (SOFTMAX_SCALE / nrm)).astype(jnp.bfloat16)

    # --- lane / sublane friendly padding (bf16 first, then pad) --------------
    K1p = _round_up(K1, 128)             # contraction dim of the score matmul
    Lp = _round_up(L, 128)               # score lanes == assembly contraction
    C9 = C * 9
    C9p = _round_up(C9, 128)             # output lanes (per-query 3x3xC block)

    # query patches with one zero row-halo above/below (flattened row-major);
    # the column shift is handled inside the kernel with masked concatenation.
    xp = jnp.pad(xpatch.astype(jnp.bfloat16), ((0, 0), (W, W), (0, K1p - K1)))

    # matching patches, transposed so the score matmul is a plain NN dot.
    wmT = jnp.pad(jnp.transpose(wm_n, (0, 2, 1)),
                  ((0, 0), (0, K1p - K1), (0, Lp - L)))

    # assembly patches pre-sliced per (dh, dw):
    #   wd[b, 3a+bb, l, c*9+3r+s] = rawp[b, l, c*81 + (3*(2-a)+r)*9 + 3*(2-bb)+s]
    # i.e. the conv_transpose taps that land on a query's own 3x3 output block
    # coming from neighbour (dh, dw) = (a-1, bb-1).
    r7 = rawp.astype(jnp.bfloat16).reshape(B, L, C, 3, 3, 3, 3)   # [B,L,C,pb,r,qb,s]
    wd = jnp.transpose(r7, (0, 3, 5, 1, 2, 4, 6))[:, ::-1, ::-1]  # [B,a,bb,L,C,r,s]
    wd = wd.reshape(B, 9, L, C9)
    wd = jnp.pad(wd, ((0, 0), (0, 0), (0, Lp - L), (0, C9p - C9)))

    tile_h = _pick_tile_h(H, W, tile_rows)
    tile_n = tile_h * W
    win_rows = (tile_h + 2) * W

    # column-edge masks (W-periodic): kill contributions that would cross an
    # image-row boundary when the attention window is shifted by dw = -1 / +1.
    jidx = np.arange(win_rows) % W
    edge = jnp.asarray(np.stack([(jidx != 0), (jidx != W - 1)],
                                axis=1).astype(np.float32))       # [win_rows, 2]

    kernel = _make_csa_kernel(H=H, W=W, L=L, Lp=Lp, tile_h=tile_h, C9p=C9p)

    grid_n = H // tile_h
    flops = 2 * B * grid_n * (win_rows * K1p * Lp + 9 * tile_n * Lp * C9p)
    transcendentals = B * grid_n * win_rows * Lp
    bytes_accessed = ((xp.size + wmT.size + wd.size) * 2 + edge.size * 4
                      + B * N * C9p * 4)

    out_hwm = pl.pallas_call(
        kernel,
        out_shape=jax.ShapeDtypeStruct((B, N, C9p), jnp.float32),
        grid_spec=pltpu.PrefetchScalarGridSpec(
            num_scalar_prefetch=0,
            grid=(B, grid_n),
            in_specs=[
                pl.BlockSpec((1, (H + 2) * W, K1p), lambda b, n: (b, 0, 0)),
                pl.BlockSpec((1, K1p, Lp), lambda b, n: (b, 0, 0)),
                pl.BlockSpec((1, 9, Lp, C9p), lambda b, n: (b, 0, 0, 0)),
                pl.BlockSpec((win_rows, 2), lambda b, n: (0, 0)),
            ],
            out_specs=pl.BlockSpec((1, tile_n, C9p), lambda b, n: (b, n, 0)),
        ),
        compiler_params=pltpu.CompilerParams(
            dimension_semantics=("parallel", "parallel"),
            vmem_limit_bytes=48 * 1024 * 1024),
        cost_estimate=pl.CostEstimate(flops=flops,
                                      transcendentals=transcendentals,
                                      bytes_accessed=bytes_accessed),
    )(xp, wmT, wd, edge)

    # useful-size permute only (the scatter-add fold already happened in VMEM):
    # [B, HW, C*9] -> [B, H, W, C, 3, 3] -> [B, C, 3H, 3W]
    y = out_hwm[:, :, :C9].reshape(B, H, W, C, 3, 3)
    return jnp.transpose(y, (0, 3, 1, 4, 2, 5)).reshape(B, C, 3 * H, 3 * W)


# ------------------------------- JAX glue -----------------------------------

def same_pad_nchw(x, k, stride):
    _, _, H, W = x.shape
    out_h = -(-H // stride)
    out_w = -(-W // stride)
    pad_h = max(0, (out_h - 1) * stride + k - H)
    pad_w = max(0, (out_w - 1) * stride + k - W)
    pt = pad_h // 2
    pb = pad_h - pt
    pleft = pad_w // 2
    pr = pad_w - pleft
    return jnp.pad(x, ((0, 0), (0, 0), (pt, pb), (pleft, pr)))


def extract_patches(x_padded, k, stride):
    """x_padded: NCHW (already padded). Returns [B, L, C*k*k], (c,di,dj) order."""
    B, C, Hp, Wp = x_padded.shape
    oh = (Hp - k) // stride + 1
    ow = (Wp - k) // stride + 1
    ii = (jnp.arange(oh) * stride)[:, None] + jnp.arange(k)[None, :]   # [oh, k]
    jj = (jnp.arange(ow) * stride)[:, None] + jnp.arange(k)[None, :]   # [ow, k]
    p = x_padded[:, :, ii[:, None, :, None], jj[None, :, None, :]]     # [B,C,oh,ow,k,k]
    p = jnp.transpose(p, (0, 2, 3, 1, 4, 5))                           # [B,oh,ow,C,k,k]
    return p.reshape(B, oh * ow, C * k * k), oh, ow


def bilinear_resize_nchw(x, out_h, out_w):
    """PyTorch F.interpolate(mode='bilinear', align_corners=False) semantics."""
    B, C, H, W = x.shape
    sh = H / out_h
    sw = W / out_w
    ys = (jnp.arange(out_h, dtype=jnp.float32) + 0.5) * sh - 0.5
    xs = (jnp.arange(out_w, dtype=jnp.float32) + 0.5) * sw - 0.5
    ys = jnp.clip(ys, 0.0, H - 1)
    xs = jnp.clip(xs, 0.0, W - 1)
    y0 = jnp.floor(ys).astype(jnp.int32)
    x0 = jnp.floor(xs).astype(jnp.int32)
    y1 = jnp.minimum(y0 + 1, H - 1)
    x1 = jnp.minimum(x0 + 1, W - 1)
    wy = (ys - y0.astype(jnp.float32))[None, None, :, None]
    wx = (xs - x0.astype(jnp.float32))[None, None, None, :]
    g = lambda yi, xi: x[:, :, yi, :][:, :, :, xi]
    top = g(y0, x0) * (1 - wx) + g(y0, x1) * wx
    bot = g(y1, x0) * (1 - wx) + g(y1, x1) * wx
    return top * (1 - wy) + bot * wy


def fold_conv_transpose(z, H, W, C, k, stride, pad):
    """Batched col2im for conv_transpose2d(stride=3, k=9, padding=3) — used
    only by the pure-JAX reference path."""
    assert k == 3 * stride
    B = z.shape[0]
    z6 = z.reshape(B, H, W, C, k, k)
    Ho = (H - 1) * stride + k
    Wo = (W - 1) * stride + k
    out = jnp.zeros((B, C, Ho, Wo), z.dtype)
    for p in range(3):
        for q in range(3):
            blk = z6[:, :, :, :, stride * p:stride * p + stride,
                     stride * q:stride * q + stride]                  # [B,H,W,C,s,s]
            blk = jnp.transpose(blk, (0, 3, 1, 4, 2, 5)).reshape(
                B, C, stride * H, stride * W)
            out = out.at[:, :, stride * p:stride * p + stride * H,
                         stride * q:stride * q + stride * W].add(blk)
    return out[:, :, pad:pad + stride * H, pad:pad + stride * W]


def forward(x, params, use_pallas=True, tile_rows=256):
    B, C, H, W = x.shape

    def conv1x1_prelu(inp, w, b, slope):
        # Cout (= C or C//2) is far below the 128-lane width -> a Pallas kernel
        # would emit masked partial stores; a fused XLA dot wins here.
        y = jnp.einsum('bchw,cd->bdhw', inp, w) + b[None, :, None, None]
        return jnp.where(y > 0.0, y, slope[0, 0] * y)

    # 1x1 conv branches (+PReLU)
    embed_w = conv1x1_prelu(x, params['wa'], params['ba'], params['aa'])       # [B,C,H,W]
    match_input = conv1x1_prelu(x, params['w1'], params['b1'], params['a1'])   # [B,C/2,H,W]

    # raw assembly patches from embed_w: k=scale*ksize=9, stride=scale=3, same pad
    kernel = SCALE * KSIZE
    raw_w, oh_r, ow_r = extract_patches(
        same_pad_nchw(embed_w, kernel, SCALE), kernel, SCALE)                  # [B, L, C*81]

    # downsampled reference, matched with conv_match_2
    Hr = int(math.floor(H * (1.0 / SCALE)))
    Wr = int(math.floor(W * (1.0 / SCALE)))
    ref = bilinear_resize_nchw(x, Hr, Wr)
    ref = conv1x1_prelu(ref, params['w2'], params['b2'], params['a2'])         # [B,C/2,Hr,Wr]
    wmatch, _, _ = extract_patches(same_pad_nchw(ref, KSIZE, 1), KSIZE, 1)     # [B, L, C/2*9]
    assert wmatch.shape[1] == raw_w.shape[1] == oh_r * ow_r

    # im2col of match_input (conv2d against the matching patches)
    xpatch, _, _ = extract_patches(same_pad_nchw(match_input, KSIZE, 1),
                                   KSIZE, 1)                                   # [B, H*W, C/2*9]

    if use_pallas:
        return cross_scale_attn_fused_pallas(xpatch, wmatch, raw_w, H, W, C,
                                             tile_rows=tile_rows)

    # ---- pure-JAX reference (mirrors the torch module step for step) --------
    nrm = jnp.maximum(jnp.sqrt(jnp.sum(wmatch * wmatch, axis=2, keepdims=True)),
                      ESCAPE_NAN)
    s = jnp.einsum('bnk,blk->bnl', xpatch, wmatch / nrm) * SOFTMAX_SCALE
    a = jax.nn.softmax(s, axis=2)
    z = jnp.einsum('bnl,blm->bnm', a, raw_w) * (1.0 / 6.0)
    return fold_conv_transpose(z, H, W, C, kernel, SCALE, SCALE)               # [B,C,3H,3W]


# --------------------------------- main --------------------------------------

if __name__ == "__main__":
    B, C, H, W = 2, 16, 12, 12                    # channels even, H,W % 3 == 0
    key = jax.random.PRNGKey(0)
    ks = jax.random.split(key, 7)
    params = {
        # conv_assembly: C -> C (1x1, bias, PReLU)
        'wa': 0.1 * jax.random.normal(ks[0], (C, C), jnp.float32),
        'ba': 0.05 * jax.random.normal(ks[1], (C,), jnp.float32),
        'aa': jnp.full((1, 1), 0.25, jnp.float32),
        # conv_match_1: C -> C//2
        'w1': 0.1 * jax.random.normal(ks[2], (C, C // 2), jnp.float32),
        'b1': 0.05 * jax.random.normal(ks[3], (C // 2,), jnp.float32),
        'a1': jnp.full((1, 1), 0.25, jnp.float32),
        # conv_match_2: C -> C//2
        'w2': 0.1 * jax.random.normal(ks[4], (C, C // 2), jnp.float32),
        'b2': 0.05 * jax.random.normal(ks[5], (C // 2,), jnp.float32),
        'a2': jnp.full((1, 1), 0.25, jnp.float32),
    }
    x = jax.random.normal(ks[6], (B, C, H, W), jnp.float32)

    # tile_rows=64 -> tile_h=4, three row tiles: exercises the tiled grid and
    # the first/middle/last-tile halo masking paths.
    out = jax.jit(lambda xx: forward(xx, params, use_pallas=True, tile_rows=64))(x)
    out = jax.block_until_ready(out)
    assert out.shape == (B, C, SCALE * H, SCALE * W), out.shape

    ref = jax.block_until_ready(forward(x, params, use_pallas=False))
    # bf16 MXU operands (f32 accumulation) + approx softmax reciprocal vs the
    # pure-f32 reference: loose-ish tolerance.
    np.testing.assert_allclose(np.asarray(out), np.asarray(ref),
                               rtol=3e-2, atol=2e-2)
    print("KERNEL_OK")
</pallas_src>

<mosaic_0001>
module attributes {stable_mosaic.version = 11 : i64} {
  func.func @kernel(%arg0: i32, %arg1: i32, %arg2: memref<1x168x128xbf16, #tpu.memory_space<vmem>>, %arg3: memref<1x128x128xbf16, #tpu.memory_space<vmem>>, %arg4: memref<1x9x128x256xbf16, #tpu.memory_space<vmem>>, %arg5: memref<72x2xf32, #tpu.memory_space<vmem>>, %arg6: memref<1x48x256xf32, #tpu.memory_space<vmem>>) attributes {dimension_semantics = [#tpu.dimension_semantics<parallel>, #tpu.dimension_semantics<parallel>], iteration_bounds = array<i64: 2, 3>, scalar_prefetch = 0 : i64, scratch_operands = 0 : i64, tpu.core_type = #tpu.core_type<tc>, window_params = [{transform_indices = @transform_0, window_bounds = array<i64: 1, 168, 128>}, {transform_indices = @transform_1, window_bounds = array<i64: 1, 128, 128>}, {transform_indices = @transform_2, window_bounds = array<i64: 1, 9, 128, 256>}, {pipeline_mode = #tpu.pipeline_mode<synchronous>, transform_indices = @transform_3, window_bounds = array<i64: 72, 2>}, {transform_indices = @transform_4, window_bounds = array<i64: 1, 48, 256>}]} {
    %c4_i32 = arith.constant 4 : i32
    %0 = arith.muli %arg1, %c4_i32 : i32
    %c48_i32 = arith.constant 48 : i32
    %1 = arith.muli %arg1, %c48_i32 : i32
    %2 = tpu.assume_multiple %1, 16 : i32
    %c0 = arith.constant 0 : index
    %3 = arith.index_cast %2 : i32 to index
    %c0_0 = arith.constant 0 : index
    %4 = vector.load %arg2[%c0, %3, %c0_0] : memref<1x168x128xbf16, #tpu.memory_space<vmem>>, vector<1x72x128xbf16>
    %5 = vector.shape_cast %4 : vector<1x72x128xbf16> to vector<72x128xbf16>
    %c0_1 = arith.constant 0 : index
    %c0_2 = arith.constant 0 : index
    %c0_3 = arith.constant 0 : index
    %6 = vector.load %arg3[%c0_1, %c0_2, %c0_3] : memref<1x128x128xbf16, #tpu.memory_space<vmem>>, vector<1x128x128xbf16>
    %7 = vector.shape_cast %6 : vector<1x128x128xbf16> to vector<128x128xbf16>
    %cst = arith.constant dense<0.000000e+00> : vector<72x128xf32>
    %8 = tpu.matmul %5, %7, %cst {dimension_numbers = #tpu.dot_dimension_numbers<[1], [0], [0], [1], [0, 0, 1, 1], [], []>} : vector<72x128xbf16>, vector<128x128xbf16>, vector<72x128xf32> -> vector<72x128xf32>
    %9 = tpu.iota {dimensions = array<i32: 1>} : vector<72x128xi32>
    %c16_i32 = arith.constant 16 : i32
    %10 = vector.broadcast %c16_i32 : i32 to vector<72x128xi32>
    %11 = arith.cmpi slt, %9, %10 : vector<72x128xi32>
    %cst_4 = arith.constant -1.000000e+30 : f32
    %12 = vector.broadcast %cst_4 : f32 to vector<72x128xf32>
    %13 = arith.select %11, %8, %12 : vector<72x128xi1>, vector<72x128xf32>
    %cst_5 = arith.constant dense<0xFF800000> : vector<72xf32>
    %14 = vector.multi_reduction <maximumf>, %13, %cst_5 [1] : vector<72x128xf32> to vector<72xf32>
    %15 = vector.shape_cast %14 : vector<72xf32> to vector<72x1xf32>
    %16 = vector.broadcast %15 : vector<72x1xf32> to vector<72x128xf32>
    %17 = arith.subf %13, %16 : vector<72x128xf32>
    %18 = math.exp %17 : vector<72x128xf32>
    %cst_6 = arith.constant dense<0.000000e+00> : vector<72xf32>
    %19 = vector.multi_reduction <add>, %18, %cst_6 [1] : vector<72x128xf32> to vector<72xf32>
    %20 = vector.shape_cast %19 : vector<72xf32> to vector<72x1xf32>
    %21 = tpu.reciprocal %20 {approx = true} : vector<72x1xf32> -> vector<72x1xf32>
    %cst_7 = arith.constant 0.166666672 : f32
    %22 = vector.broadcast %cst_7 : f32 to vector<72x1xf32>
    %23 = arith.mulf %21, %22 : vector<72x1xf32>
    %24 = vector.broadcast %23 : vector<72x1xf32> to vector<72x128xf32>
    %25 = arith.mulf %18, %24 : vector<72x128xf32>
    %26 = tpu.iota {dimensions = array<i32: 0>} : vector<72x128xi32>
    %c0_i32 = arith.constant 0 : i32
    %27 = arith.cmpi eq, %0, %c0_i32 : i32
    %c12_i32 = arith.constant 12 : i32
    %c0_i32_8 = arith.constant 0 : i32
    %28 = arith.select %27, %c12_i32, %c0_i32_8 : i32
    %c4_i32_9 = arith.constant 4 : i32
    %29 = arith.addi %0, %c4_i32_9 : i32
    %c12_i32_10 = arith.constant 12 : i32
    %30 = arith.cmpi eq, %29, %c12_i32_10 : i32
    %c60_i32 = arith.constant 60 : i32
    %c72_i32 = arith.constant 72 : i32
    %31 = arith.select %30, %c60_i32, %c72_i32 : i32
    %32 = vector.broadcast %28 : i32 to vector<72x128xi32>
    %33 = arith.cmpi sge, %26, %32 : vector<72x128xi32>
    %34 = vector.broadcast %31 : i32 to vector<72x128xi32>
    %35 = arith.cmpi slt, %26, %34 : vector<72x128xi32>
    %36 = arith.andi %33, %35 : vector<72x128xi1>
    %cst_11 = arith.constant 0.000000e+00 : f32
    %37 = vector.broadcast %cst_11 : f32 to vector<72x128xf32>
    %38 = arith.select %36, %25, %37 : vector<72x128xi1>, vector<72x128xf32>
    %cst_12 = arith.constant 0.000000e+00 : f32
    %39 = vector.broadcast %cst_12 : f32 to vector<1x128xf32>
    %40 = vector.extract_strided_slice %38 {offsets = [0, 0], sizes = [71, 128], strides = [1, 1]} : vector<72x128xf32> to vector<71x128xf32>
    %41 = tpu.concatenate %39, %40 in 0 : vector<1x128xf32>, vector<71x128xf32> -> vector<72x128xf32>
    %c0_13 = arith.constant 0 : index
    %c0_14 = arith.constant 0 : index
    %42 = vector.load %arg5[%c0_13, %c0_14] : memref<72x2xf32, #tpu.memory_space<vmem>>, vector<72x1xf32>
    %43 = vector.broadcast %42 : vector<72x1xf32> to vector<72x128xf32>
    %44 = arith.mulf %41, %43 : vector<72x128xf32>
    %45 = vector.extract_strided_slice %38 {offsets = [1, 0], sizes = [71, 128], strides = [1, 1]} : vector<72x128xf32> to vector<71x128xf32>
    %46 = tpu.concatenate %45, %39 in 0 : vector<71x128xf32>, vector<1x128xf32> -> vector<72x128xf32>
    %c0_15 = arith.constant 0 : index
    %c1 = arith.constant 1 : index
    %47 = vector.load %arg5[%c0_15, %c1] : memref<72x2xf32, #tpu.memory_space<vmem>>, vector<72x1xf32>
    %48 = vector.broadcast %47 : vector<72x1xf32> to vector<72x128xf32>
    %49 = arith.mulf %46, %48 : vector<72x128xf32>
    %cst_16 = arith.constant 0.000000e+00 : f32
    %50 = vector.broadcast %cst_16 : f32 to vector<48x256xf32>
    %51 = vector.extract_strided_slice %44 {offsets = [0, 0], sizes = [48, 128], strides = [1, 1]} : vector<72x128xf32> to vector<48x128xf32>
    %52 = arith.truncf %51 : vector<48x128xf32> to vector<48x128xbf16>
    %c0_17 = arith.constant 0 : index
    %c0_18 = arith.constant 0 : index
    %c0_19 = arith.constant 0 : index
    %c0_20 = arith.constant 0 : index
    %53 = vector.load %arg4[%c0_17, %c0_18, %c0_19, %c0_20] : memref<1x9x128x256xbf16, #tpu.memory_space<vmem>>, vector<1x1x128x256xbf16>
    %54 = vector.shape_cast %53 : vector<1x1x128x256xbf16> to vector<128x256xbf16>
    %cst_21 = arith.constant dense<0.000000e+00> : vector<48x256xf32>
    %55 = tpu.matmul %52, %54, %cst_21 {dimension_numbers = #tpu.dot_dimension_numbers<[1], [0], [0], [1], [0, 0, 1, 1], [], []>} : vector<48x128xbf16>, vector<128x256xbf16>, vector<48x256xf32> -> vector<48x256xf32>
    %56 = arith.addf %50, %55 : vector<48x256xf32>
    %57 = vector.extract_strided_slice %38 {offsets = [0, 0], sizes = [48, 128], strides = [1, 1]} : vector<72x128xf32> to vector<48x128xf32>
    %58 = arith.truncf %57 : vector<48x128xf32> to vector<48x128xbf16>
    %c0_22 = arith.constant 0 : index
    %c1_23 = arith.constant 1 : index
    %c0_24 = arith.constant 0 : index
    %c0_25 = arith.constant 0 : index
    %59 = vector.load %arg4[%c0_22, %c1_23, %c0_24, %c0_25] : memref<1x9x128x256xbf16, #tpu.memory_space<vmem>>, vector<1x1x128x256xbf16>
    %60 = vector.shape_cast %59 : vector<1x1x128x256xbf16> to vector<128x256xbf16>
    %cst_26 = arith.constant dense<0.000000e+00> : vector<48x256xf32>
    %61 = tpu.matmul %58, %60, %cst_26 {dimension_numbers = #tpu.dot_dimension_numbers<[1], [0], [0], [1], [0, 0, 1, 1], [], []>} : vector<48x128xbf16>, vector<128x256xbf16>, vector<48x256xf32> -> vector<48x256xf32>
    %62 = arith.addf %56, %61 : vector<48x256xf32>
    %63 = vector.extract_strided_slice %49 {offsets = [0, 0], sizes = [48, 128], strides = [1, 1]} : vector<72x128xf32> to vector<48x128xf32>
    %64 = arith.truncf %63 : vector<48x128xf32> to vector<48x128xbf16>
    %c0_27 = arith.constant 0 : index
    %c2 = arith.constant 2 : index
    %c0_28 = arith.constant 0 : index
    %c0_29 = arith.constant 0 : index
    %65 = vector.load %arg4[%c0_27, %c2, %c0_28, %c0_29] : memref<1x9x128x256xbf16, #tpu.memory_space<vmem>>, vector<1x1x128x256xbf16>
    %66 = vector.shape_cast %65 : vector<1x1x128x256xbf16> to vector<128x256xbf16>
    %cst_30 = arith.constant dense<0.000000e+00> : vector<48x256xf32>
    %67 = tpu.matmul %64, %66, %cst_30 {dimension_numbers = #tpu.dot_dimension_numbers<[1], [0], [0], [1], [0, 0, 1, 1], [], []>} : vector<48x128xbf16>, vector<128x256xbf16>, vector<48x256xf32> -> vector<48x256xf32>
    %68 = arith.addf %62, %67 : vector<48x256xf32>
    %69 = vector.extract_strided_slice %44 {offsets = [12, 0], sizes = [48, 128], strides = [1, 1]} : vector<72x128xf32> to vector<48x128xf32>
    %70 = arith.truncf %69 : vector<48x128xf32> to vector<48x128xbf16>
    %c0_31 = arith.constant 0 : index
    %c3 = arith.constant 3 : index
    %c0_32 = arith.constant 0 : index
    %c0_33 = arith.constant 0 : index
    %71 = vector.load %arg4[%c0_31, %c3, %c0_32, %c0_33] : memref<1x9x128x256xbf16, #tpu.memory_space<vmem>>, vector<1x1x128x256xbf16>
    %72 = vector.shape_cast %71 : vector<1x1x128x256xbf16> to vector<128x256xbf16>
    %cst_34 = arith.constant dense<0.000000e+00> : vector<48x256xf32>
    %73 = tpu.matmul %70, %72, %cst_34 {dimension_numbers = #tpu.dot_dimension_numbers<[1], [0], [0], [1], [0, 0, 1, 1], [], []>} : vector<48x128xbf16>, vector<128x256xbf16>, vector<48x256xf32> -> vector<48x256xf32>
    %74 = arith.addf %68, %73 : vector<48x256xf32>
    %75 = vector.extract_strided_slice %38 {offsets = [12, 0], sizes = [48, 128], strides = [1, 1]} : vector<72x128xf32> to vector<48x128xf32>
    %76 = arith.truncf %75 : vector<48x128xf32> to vector<48x128xbf16>
    %c0_35 = arith.constant 0 : index
    %c4 = arith.constant 4 : index
    %c0_36 = arith.constant 0 : index
    %c0_37 = arith.constant 0 : index
    %77 = vector.load %arg4[%c0_35, %c4, %c0_36, %c0_37] : memref<1x9x128x256xbf16, #tpu.memory_space<vmem>>, vector<1x1x128x256xbf16>
    %78 = vector.shape_cast %77 : vector<1x1x128x256xbf16> to vector<128x256xbf16>
    %cst_38 = arith.constant dense<0.000000e+00> : vector<48x256xf32>
    %79 = tpu.matmul %76, %78, %cst_38 {dimension_numbers = #tpu.dot_dimension_numbers<[1], [0], [0], [1], [0, 0, 1, 1], [], []>} : vector<48x128xbf16>, vector<128x256xbf16>, vector<48x256xf32> -> vector<48x256xf32>
    %80 = arith.addf %74, %79 : vector<48x256xf32>
    %81 = vector.extract_strided_slice %49 {offsets = [12, 0], sizes = [48, 128], strides = [1, 1]} : vector<72x128xf32> to vector<48x128xf32>
    %82 = arith.truncf %81 : vector<48x128xf32> to vector<48x128xbf16>
    %c0_39 = arith.constant 0 : index
    %c5 = arith.constant 5 : index
    %c0_40 = arith.constant 0 : index
    %c0_41 = arith.constant 0 : index
    %83 = vector.load %arg4[%c0_39, %c5, %c0_40, %c0_41] : memref<1x9x128x256xbf16, #tpu.memory_space<vmem>>, vector<1x1x128x256xbf16>
    %84 = vector.shape_cast %83 : vector<1x1x128x256xbf16> to vector<128x256xbf16>
    %cst_42 = arith.constant dense<0.000000e+00> : vector<48x256xf32>
    %85 = tpu.matmul %82, %84, %cst_42 {dimension_numbers = #tpu.dot_dimension_numbers<[1], [0], [0], [1], [0, 0, 1, 1], [], []>} : vector<48x128xbf16>, vector<128x256xbf16>, vector<48x256xf32> -> vector<48x256xf32>
    %86 = arith.addf %80, %85 : vector<48x256xf32>
    %87 = vector.extract_strided_slice %44 {offsets = [24, 0], sizes = [48, 128], strides = [1, 1]} : vector<72x128xf32> to vector<48x128xf32>
    %88 = arith.truncf %87 : vector<48x128xf32> to vector<48x128xbf16>
    %c0_43 = arith.constant 0 : index
    %c6 = arith.constant 6 : index
    %c0_44 = arith.constant 0 : index
    %c0_45 = arith.constant 0 : index
    %89 = vector.load %arg4[%c0_43, %c6, %c0_44, %c0_45] : memref<1x9x128x256xbf16, #tpu.memory_space<vmem>>, vector<1x1x128x256xbf16>
    %90 = vector.shape_cast %89 : vector<1x1x128x256xbf16> to vector<128x256xbf16>
    %cst_46 = arith.constant dense<0.000000e+00> : vector<48x256xf32>
    %91 = tpu.matmul %88, %90, %cst_46 {dimension_numbers = #tpu.dot_dimension_numbers<[1], [0], [0], [1], [0, 0, 1, 1], [], []>} : vector<48x128xbf16>, vector<128x256xbf16>, vector<48x256xf32> -> vector<48x256xf32>
    %92 = arith.addf %86, %91 : vector<48x256xf32>
    %93 = vector.extract_strided_slice %38 {offsets = [24, 0], sizes = [48, 128], strides = [1, 1]} : vector<72x128xf32> to vector<48x128xf32>
    %94 = arith.truncf %93 : vector<48x128xf32> to vector<48x128xbf16>
    %c0_47 = arith.constant 0 : index
    %c7 = arith.constant 7 : index
    %c0_48 = arith.constant 0 : index
    %c0_49 = arith.constant 0 : index
    %95 = vector.load %arg4[%c0_47, %c7, %c0_48, %c0_49] : memref<1x9x128x256xbf16, #tpu.memory_space<vmem>>, vector<1x1x128x256xbf16>
    %96 = vector.shape_cast %95 : vector<1x1x128x256xbf16> to vector<128x256xbf16>
    %cst_50 = arith.constant dense<0.000000e+00> : vector<48x256xf32>
    %97 = tpu.matmul %94, %96, %cst_50 {dimension_numbers = #tpu.dot_dimension_numbers<[1], [0], [0], [1], [0, 0, 1, 1], [], []>} : vector<48x128xbf16>, vector<128x256xbf16>, vector<48x256xf32> -> vector<48x256xf32>
    %98 = arith.addf %92, %97 : vector<48x256xf32>
    %99 = vector.extract_strided_slice %49 {offsets = [24, 0], sizes = [48, 128], strides = [1, 1]} : vector<72x128xf32> to vector<48x128xf32>
    %100 = arith.truncf %99 : vector<48x128xf32> to vector<48x128xbf16>
    %c0_51 = arith.constant 0 : index
    %c8 = arith.constant 8 : index
    %c0_52 = arith.constant 0 : index
    %c0_53 = arith.constant 0 : index
    %101 = vector.load %arg4[%c0_51, %c8, %c0_52, %c0_53] : memref<1x9x128x256xbf16, #tpu.memory_space<vmem>>, vector<1x1x128x256xbf16>
    %102 = vector.shape_cast %101 : vector<1x1x128x256xbf16> to vector<128x256xbf16>
    %cst_54 = arith.constant dense<0.000000e+00> : vector<48x256xf32>
    %103 = tpu.matmul %100, %102, %cst_54 {dimension_numbers = #tpu.dot_dimension_numbers<[1], [0], [0], [1], [0, 0, 1, 1], [], []>} : vector<48x128xbf16>, vector<128x256xbf16>, vector<48x256xf32> -> vector<48x256xf32>
    %104 = arith.addf %98, %103 : vector<48x256xf32>
    %c0_55 = arith.constant 0 : index
    %c0_56 = arith.constant 0 : index
    %c0_57 = arith.constant 0 : index
    %105 = vector.load %arg6[%c0_55, %c0_56, %c0_57] : memref<1x48x256xf32, #tpu.memory_space<vmem>>, vector<1x48x256xf32>
    %106 = vector.shape_cast %105 : vector<1x48x256xf32> to vector<48x256xf32>
    %107 = vector.shape_cast %104 : vector<48x256xf32> to vector<1x48x256xf32>
    tpu.vector_store %arg6[%c0_55, %c0_56, %c0_57], %107 {strides = array<i32>} : memref<1x48x256xf32, #tpu.memory_space<vmem>>, vector<1x48x256xf32>,
    return
  }
  func.func @transform_0(%arg0: i32, %arg1: i32) -> (i32, i32, i32) {
    %c0_i32 = arith.constant 0 : i32
    %c0_i32_0 = arith.constant 0 : i32
    %c0_i32_1 = arith.constant 0 : i32
    return %arg0, %c0_i32, %c0_i32_0 : i32, i32, i32
  }
  func.func @transform_1(%arg0: i32, %arg1: i32) -> (i32, i32, i32) {
    %c0_i32 = arith.constant 0 : i32
    %c0_i32_0 = arith.constant 0 : i32
    %c0_i32_1 = arith.constant 0 : i32
    return %arg0, %c0_i32, %c0_i32_0 : i32, i32, i32
  }
  func.func @transform_2(%arg0: i32, %arg1: i32) -> (i32, i32, i32, i32) {
    %c0_i32 = arith.constant 0 : i32
    %c0_i32_0 = arith.constant 0 : i32
    %c0_i32_1 = arith.constant 0 : i32
    %c0_i32_2 = arith.constant 0 : i32
    return %arg0, %c0_i32, %c0_i32_0, %c0_i32_1 : i32, i32, i32, i32
  }
  func.func @transform_3(%arg0: i32, %arg1: i32) -> (i32, i32) {
    %c0_i32 = arith.constant 0 : i32
    %c0_i32_0 = arith.constant 0 : i32
    %c0_i32_1 = arith.constant 0 : i32
    return %c0_i32, %c0_i32_0 : i32, i32
  }
  func.func @transform_4(%arg0: i32, %arg1: i32) -> (i32, i32, i32) {
    %c0_i32 = arith.constant 0 : i32
    %c0_i32_0 = arith.constant 0 : i32
    return %arg0, %arg1, %c0_i32 : i32, i32, i32
  }
}

</mosaic_0001>

<bundles_post_ra>
// kernel: _lambda_.1
= control target key start
LH: loop header
LB: loop body
LE: loop exit
PB: predicated region body
PF: predicated region fallthrough
CT: control target
= control target key end

     0   :  { %s3430_s15 = smov 0   ;;  %s3432_s16 = smov 0   ;;  %s4486_s0 = inlined_call_operand.vmem [shape: bf16[2,168,128], index: 0, kind: input, shape index: {}]   ;;  %s4487_s1 = inlined_call_operand.vmem [shape: bf16[2,128,128], index: 1, kind: input, shape index: {}]   ;;  %s4488_s2 = inlined_call_operand.vmem [shape: bf16[2,9,128,256], index: 2, kind: input, shape index: {}]   ;;  %s4489_s3 = inlined_call_operand.vmem [shape: f32[72,2], index: 3, kind: input, shape index: {}]   ;;  %s4490_s4 = inlined_call_operand.vmem [shape: f32[2,144,256], index: 4, kind: output, shape index: {}]  }
   0x1   :  { %s3434_s17 = smov 0   ;;  %s3436_s18 = smov 0  }
   0x2   :  { %s3438_s19 = smov 0  }
   0x3 LB: > { %s23_s20 = sadd.s32 1, %s3393_s17  ;;  %s26_s21 = sadd.s32 1, %s3397_s18  ;;  %s3401_s19 = sphi %s3438_s19, %s14_s19   ;;  %s3397_s18 = sphi %s3436_s18, %s4512_s18   ;;  %s3393_s17 = sphi %s3434_s17, %s4511_s17   ;;  %s3389_s16 = sphi %s3432_s16, %s4510_s16   ;;  %s3385_s15 = sphi %s3430_s15, %s4509_s15  }
   0x4   : > { %p24_p0 = scmp.ge.s32.totalorder %s23_s20, 3  ;;  %p2318_p1 = scmp.ge.s32.totalorder %s3401_s19, 1 }
   0x5   : > { %p196_p2 = scmp.lt.s32.totalorder %s3401_s19, 7 }
   0x6   : > { %s4514_s20 = smov (%p24_p0, %s23_s20), 0  ;;  %s4516_s21 = smov (!%p24_p0, %s26_s21), %s3397_s18 }
   0x7   : > { %p197_p3 = pnand %p2318_p1, %p196_p2  ;;  %p28_p4 = scmp.ge.s32.totalorder %s4516_s21, 2 }
   0x8   : > { %p237_p5 = scmp.lt.s32.totalorder (!%p197_p3), %s3389_s16, 1  ;;  %s264_s26 = smul.u32 (!%p197_p3), 48, %s3385_s15 }
   0x9   : > { %s4518_s21 = smov (%p28_p4, %s4516_s21), 0  ;;  %200 = sbr.rel (%p197_p3) target bundleno = 879 (0x36f), region = 36 }
   0xa   : > { %s265_s28 = sshra.s32 (!%p197_p3), %s264_s26, 3 }
   0xb   : > { %s2326_s6 = sshll.u32 (!%p197_p3), %s265_s28, 2 }
   0xe   : > { %s4520_s16 = smov (!%p237_p5, %s3389_s16), 1  ;;  %v3480_v10 = vld [vmem:[%s4489_s3] sm:$0xff]  ;;  %v3485_v11 = vld [vmem:[%s4489_s3 + $0x8] sm:$0xff]  ;;  %v3403_v12 = vmov 0   ;;  %v3495_v13 = vld [vmem:[%s4489_s3 + $0x18] sm:$0xff]  ;;  %v403_v17 = vlaneseq  ;;  %v3404_v45 = vmov 1  }
   0xf   : > { %s3117_s22 = sshll.u32 %s4520_s16, 6  ;;  %s3274_s27 = smul.u32 84, %s4520_s16  ;;  %3319 = vset.pattern.permute.xlu1 %v3403_v12  ;;  %3320 = vset.pattern.permute.xlu2 %v3403_v12  ;;  %v3500_v14 = vld [vmem:[%s4489_s3 + $0x10] sm:$0xff]  ;;  %vm567_vm6 = vcmask 1040384  }
  0x10   : > { %s246_s25 = scalar_lea.vmem %s4487_s1, %s3117_s22  ;;  %606 = vperm.xlu1 %3319, %v3480_v10   ;;  %611 = vperm.xlu2 %3320, %v3485_v11   ;;  %v3507_v18 = vand.u32 127, %v403_v17  ;;  %s252_s22 = smul.u32 6, %s3385_s15 }
  0x11   : > { %v3129_v0 = vld [vmem:[%s246_s25 + $0x38] sm:$0xff]  ;;  %v3128_v1 = vld [vmem:[%s246_s25 + $0x30] sm:$0xff]  ;;  %v3127_v2 = vld [vmem:[%s246_s25 + $0x28] sm:$0xff]  ;;  %s241_s5 = scalar_lea.vmem %s4486_s0, %s3274_s27  ;;  %3321 = vset.pattern.permute.xlu0 %v3403_v12  ;;  %s3275_s27 = smul.u32 1152, %s4520_s16 }
  0x12   : > { %370 = vmatpush.bf16.msra.mxu0 %v3129_v0  ;;  %v3126_v3 = vld [vmem:[%s246_s25 + $0x20] sm:$0xff]  ;;  %v3125_v4 = vld [vmem:[%s246_s25 + $0x18] sm:$0xff]  ;;  %v3124_v5 = vld [vmem:[%s246_s25 + $0x10] sm:$0xff]  ;;  %s3473_s7 = scalar_lea.vmem %s241_s5, %s2326_s6  ;;  %vm405_vm0 = vcmp.lt.s32.totalorder %v3507_v18, 16  ;;  %s2325_s5 = sshll.u32 %s3385_s15, 2 }
  0x13   : > { %v3123_v6 = vld [vmem:[%s246_s25 + $0x8] sm:$0xff]  ;;  %v3122_v7 = vld [vmem:[%s246_s25] sm:$0xff]  ;;  %v3120_v15 = vld [vmem:[%s3473_s7 + $0x10] sm:$0xff]  ;;  %s3569_s30 = scalar_lea.vmem %s4488_s2, %s3275_s27  ;;  %s517_s6 = sadd.s32 4, %s2325_s5 }
  0x14   : > { %v3118_v8 = vld [vmem:[%s3473_s7] sm:$0xff]  ;;  %v3119_v9 = vld [vmem:[%s3473_s7 + $0x8] sm:$0xff]  ;;  %v3121_v16 = vld [vmem:[%s3473_s7 + $0x18] sm:$0xff]  ;;  %p515_p6 = scmp.eq.s32.totalorder %s2325_s5, 0  ;;  %p518_p7 = scmp.eq.s32.totalorder %s517_s6, 12 }
  0x15   : > { %v277_v25 = vld [vmem:[%s3473_s7 + $0x20] sm:$0xf]  ;;  %v3555_v0 = vld [vmem:[%s4489_s3 + $0x28] sm:$0xff]  ;;  %v3144_v18 = vld [vmem:[%s3569_s30 + $0x74] sm:$0xf]  ;;  %p255_p8 = scmp.lt.s32.totalorder %s252_s22, 17 }
  0x16   : > { %371 = vmatpush.bf16.msra.mxu0 %v3128_v1  ;;  %v311_v26 = vunpack.c.l.b16 %v277_v25  ;;  %s516_s7 = scalar_select %p515_p6, 12, 0 }
  0x17   : > { %s519_s8 = scalar_select %p518_p7, 60, 72 }
  0x18   : > { %621 = vperm.xlu1 %3319, %v3495_v13   ;;  %616 = vperm.xlu2 %3320, %v3500_v14   ;;  %v316_v27 = vpack.c.b16 %v311_v26, %v311_v26  ;;  %v3157_v26 = vld [vmem:[%s3569_s30 + $0xd4] sm:$0xf0]  ;;  %s4522_s22 = smov (!%p255_p8, %s252_s22), 17  ;;  %s3276_s23 = smul.u32 36, %s4520_s16 }
  0x19   : > { %s2323_s15 = sshll.u32 %s4522_s22, 1 }
  0x1a   : > { %372 = vmatpush.bf16.msra.mxu0 %v3127_v2  ;;  %v599_v2 = vld [vmem:[%s4489_s3 + $0x20] sm:$0xff]  ;;  %s259_s24 = sadd.s32 %s3276_s23, %s2323_s15 }
  0x1b   : > { %s2324_s25 = sshll.u32 %s259_s24, 3 }
  0x1c   : > { %s4439_s27 = scalar_lea.vmem %s4490_s4, %s2324_s25 }
  0x1e   : > { %373 = vmatpush.bf16.msra.mxu0 %v3126_v3 }
  0x20   : > { %3322 = vset.pattern.permute.xlu1 %v3404_v45 }
  0x22   : > { %374 = vmatpush.bf16.msra.mxu0 %v3125_v4  ;;  %v2449_v4 = vld [vmem:[%s3569_s30 + $0xf0] sm:$0xf] }
  0x26   : > { %375 = vmatpush.bf16.msra.mxu0 %v3124_v5  ;;  %v3161_v5 = vld [vmem:[%s3569_s30 + $0xf4] sm:$0xf0] }
  0x2a   : > { %376 = vmatpush.bf16.msra.mxu0 %v3123_v6  ;;  %v3160_v6 = vld [vmem:[%s3569_s30 + $0xf4] sm:$0xf] }
  0x2e   : > { %377 = vmatpush.bf16.msra.mxu0 %v3122_v7 }
  0x31   : > { %378 = vmatmul.bf16.vlgmr.msra.gmra.mxu0 %v3118_v8  ;;  %v2450_v8 = vor.u32 %v3161_v5, %v2449_v4  ;;  %v2409_v4 = vld [vmem:[%s3569_s30 + $0xa0] sm:$0xf]  ;;  %v3151_v5 = vld [vmem:[%s3569_s30 + $0xa4] sm:$0xf0] }
  0x33   : > { %850 = vmatpush.bf16.msra.mxu1 %v2450_v8  ;;  %v2410_v8 = vor.u32 %v3151_v5, %v2409_v4  ;;  %v3142_v5 = vld [vmem:[%s3569_s30 + $0x64] sm:$0xf]  ;;  %v3183_v4 = vld [vmem:[%s3569_s30 + $0x1a4] sm:$0xf0] }
  0x41   : > { %383 = vmatmul.bf16.gmra.mxu0 %v3119_v9  ;;  %v2451_v9 = vld [vmem:[%s3569_s30 + $0xf8] sm:$0xf0] }
  0x51   : > { %388 = vmatmul.bf16.gmra.mxu0 %v3120_v15  ;;  %v2454_v15 = vor.u32 %v3160_v6, %v2451_v9  ;;  %v3150_v6 = vld [vmem:[%s3569_s30 + $0xa4] sm:$0xf]  ;;  %v2411_v9 = vld [vmem:[%s3569_s30 + $0xa8] sm:$0xf0] }
  0x53   : > { %874 = vmatpush.bf16.msra.mxu2 %v2454_v15  ;;  %v3137_v15 = vld [vmem:[%s3569_s30 + $0x34] sm:$0xf0] }
  0x61   : > { %393 = vmatmul.bf16.gmra.mxu0 %v3121_v16  ;;  %v3158_v16 = vld [vmem:[%s3569_s30 + $0xe4] sm:$0xf] }
  0x6a   : > { %v3535_v46 = vpop.permute.xlu2 %611 }
  0x71   : > { %398 = vmatmul.bf16.gmra.mxu0 %v316_v27  ;;  %v3156_v27 = vld [vmem:[%s3569_s30 + $0xd4] sm:$0xf] }
  0x72   : > { %v3540_v51 = vpop.permute.xlu2 %616 }
  0x82   : > { %v3528_v36 = vpop.permute.xlu1 %606 }
  0x8a   : > { %v3530_v40 = vpop.permute.xlu1 %621 }
  0xae   : > { %v379_v19 = vpop.f32.mrf.mxu0 }
  0xaf   : > { %v406_v20 = vsel %vm405_vm0, %v379_v19, -1e+30  ;;  %v2443_v19 = vld [vmem:[%s3569_s30 + $0xe8] sm:$0xf0] }
  0xb0   : > { %415 = vmax.xlane.f32.xlu0 %v406_v20 }
  0xb6   : > { %v381_v21 = vpop.f32.mrf.mxu0 }
  0xb7   : > { %v407_v22 = vsel %vm405_vm0, %v381_v21, -1e+30 }
  0xb8   : > { %417 = vmax.xlane.f32.xlu0 %v407_v22 }
  0xbe   : > { %v384_v23 = vpop.f32.mrf.mxu0 }
  0xbf   : > { %v408_v24 = vsel %vm405_vm0, %v384_v23, -1e+30 }
  0xc0   : > { %419 = vmax.xlane.f32.xlu1 %v408_v24 }
  0xc6   : > { %v386_v28 = vpop.f32.mrf.mxu0 }
  0xc7   : > { %v409_v29 = vsel %vm405_vm0, %v386_v28, -1e+30  ;;  %v2435_v28 = vld [vmem:[%s3569_s30 + $0xd8] sm:$0xf0] }
  0xc8   : > { %421 = vmax.xlane.f32.xlu1 %v409_v29 }
  0xce   : > { %v389_v30 = vpop.f32.mrf.mxu0 }
  0xcf   : > { %v410_v31 = vsel %vm405_vm0, %v389_v30, -1e+30 }
  0xd0   : > { %423 = vmax.xlane.f32.xlu2 %v410_v31 }
  0xd6   : > { %v391_v32 = vpop.f32.mrf.mxu0 }
  0xd7   : > { %v411_v33 = vsel %vm405_vm0, %v391_v32, -1e+30  ;;  %v2438_v32 = vor.u32 %v3156_v27, %v2435_v28  ;;  %v2393_v27 = vld [vmem:[%s3569_s30 + $0x80] sm:$0xf]  ;;  %v3147_v28 = vld [vmem:[%s3569_s30 + $0x84] sm:$0xf0] }
  0xd8   : > { %425 = vmax.xlane.f32.xlu2 %v411_v33 }
  0xde   : > { %v394_v34 = vpop.f32.mrf.mxu0 }
  0xdf   : > { %v3525_v35 = vsel %vm405_vm0, %v394_v34, -1e+30 }
  0xe0   : > { %427 = vmax.xlane.f32.xlu0 %v3525_v35 }
  0xe6   : > { %v396_v3 = vpop.f32.mrf.mxu0 }
  0xee   : > { %v3574_v7 = vpop.f32.mrf.mxu0 }
 0x123   : > { %v416_v37 = vpop.xlane.xlu0 %415 }
 0x124   : > { %v433_v38 = vsub.f32 %v406_v20, %v416_v37  ;;  %v2531_v20 = vld [vmem:[%s3569_s30 + $0x70] sm:$0xf]  ;;  %v2523_v37 = vld [vmem:[%s3569_s30 + $0x60] sm:$0xf] }
 0x126   : > { %v442_v39 = vmul.f32 1.442695, %v433_v38  ;;  %v3143_v38 = vld [vmem:[%s3569_s30 + $0x64] sm:$0xf0] }
 0x128   : > { %3327 = vpow2.f32 %v442_v39  ;;  %v2425_v39 = vld [vmem:[%s3569_s30 + $0xc0] sm:$0xf] }
 0x12b   : > { %v418_v41 = vpop.xlane.xlu0 %417 }
 0x12c   : > { %v434_v42 = vsub.f32 %v407_v22, %v418_v41  ;;  %v3145_v22 = vld [vmem:[%s3569_s30 + $0x74] sm:$0xf0]  ;;  %v3155_v41 = vld [vmem:[%s3569_s30 + $0xc4] sm:$0xf0] }
 0x12d   : > { %v2532_v25 = vor.u32 %v3145_v22, %v2531_v20  ;;  %v3149_v20 = vld [vmem:[%s3569_s30 + $0x94] sm:$0xf0] }
 0x12e   : > { %v3532_v43 = vpop.eup %3327  ;;  %v444_v44 = vmul.f32 1.442695, %v434_v42  ;;  %v3154_v42 = vld [vmem:[%s3569_s30 + $0xc4] sm:$0xf] }
 0x12f   : > { %460 = vadd.xlane.f32.xlu0 %v3532_v43  ;;  %978 = vmatpush.bf16.msra.mxu3 %v2532_v25  ;;  %v2491_v25 = vld [vmem:[%s3569_s30 + $0x20] sm:$0xf] }
 0x130   : > { %3329 = vpow2.f32 %v444_v44  ;;  %v2426_v44 = vor.u32 %v3155_v41, %v2425_v39  ;;  %v3131_v39 = vld [vmem:[%s3569_s30 + $0x4] sm:$0xf0] }
 0x133   : > { %v420_v47 = vpop.xlane.xlu1 %419 }
 0x134   : > { %v435_v48 = vsub.f32 %v408_v24, %v420_v47  ;;  %v2446_v24 = vor.u32 %v3158_v16, %v2443_v19  ;;  %v2401_v19 = vld [vmem:[%s3569_s30 + $0x90] sm:$0xf] }
 0x135   : > { %v2402_v22 = vor.u32 %v3149_v20, %v2401_v19 }
 0x136   : > { %v3537_v49 = vpop.eup %3329  ;;  %v446_v50 = vmul.f32 1.442695, %v435_v48  ;;  %875 = vmatpush.bf16.msra.mxu2 %v2446_v24  ;;  %v2515_v48 = vld [vmem:[%s3569_s30 + $0x50] sm:$0xf] }
 0x137   : > { %462 = vadd.xlane.f32.xlu1 %v3537_v49 }
 0x138   : > { %3331 = vpow2.f32 %v446_v50  ;;  %v3141_v50 = vld [vmem:[%s3569_s30 + $0x54] sm:$0xf0] }
 0x13a   : > { %876 = vmatpush.bf16.msra.mxu2 %v2438_v32  ;;  %v2395_v32 = vld [vmem:[%s3569_s30 + $0x88] sm:$0xf0] }
 0x13b   : > { %v422_v52 = vpop.xlane.xlu1 %421 }
 0x13c   : > { %v436_v53 = vsub.f32 %v409_v29, %v422_v52  ;;  %v3590_v29 = vsel %vm405_vm0, %v396_v3, -1e+30  ;;  %v2516_v52 = vor.u32 %v3141_v50, %v2515_v48  ;;  %v2691_v48 = vld [vmem:[%s3569_s30 + $0x1f0] sm:$0xf] }
 0x13e   : > { %v3542_v54 = vpop.eup %3331  ;;  %v448_v55 = vmul.f32 1.442695, %v436_v53  ;;  %v2417_v53 = vld [vmem:[%s3569_s30 + $0xb0] sm:$0xf] }
 0x13f   : > { %464 = vadd.xlane.f32.xlu2 %v3542_v54 }
 0x140   : > { %3333 = vpow2.f32 %v448_v55  ;;  %v3153_v55 = vld [vmem:[%s3569_s30 + $0xb4] sm:$0xf0] }
 0x143   : > { %v424_v56 = vpop.xlane.xlu2 %423 }
 0x144   : > { %v437_v57 = vsub.f32 %v410_v31, %v424_v56  ;;  %v3152_v56 = vld [vmem:[%s3569_s30 + $0xb4] sm:$0xf] }
 0x146   : > { %v3545_v58 = vpop.eup %3333  ;;  %v450_v59 = vmul.f32 1.442695, %v437_v57  ;;  %v2418_v57 = vor.u32 %v3153_v55, %v2417_v53  ;;  %v3177_v55 = vld [vmem:[%s3569_s30 + $0x174] sm:$0xf0] }
 0x147   : > { %466 = vadd.xlane.f32.xlu0 %v3545_v58 }
 0x148   : > { %3335 = vpow2.f32 %v450_v59  ;;  %v2419_v59 = vld [vmem:[%s3569_s30 + $0xb8] sm:$0xf0] }
 0x14b   : > { %v426_v60 = vpop.xlane.xlu2 %425 }
 0x14c   : > { %v438_v61 = vsub.f32 %v411_v33, %v426_v60  ;;  %v401_v33 = vpop.f32.mrf.mxu0 }
 0x14e   : > { %v3548_v62 = vpop.eup %3335  ;;  %v452_v63 = vmul.f32 1.442695, %v438_v61  ;;  %v2422_v61 = vor.u32 %v3152_v56, %v2419_v59  ;;  %v2683_v56 = vld [vmem:[%s3569_s30 + $0x1e0] sm:$0xf] }
 0x14f   : > { %468 = vadd.xlane.f32.xlu0 %v3548_v62 }
 0x150   : > { %3337 = vpow2.f32 %v452_v63  ;;  %687 = vperm.xlu1 %3322, %v3480_v10   ;;  %v2441_v10 = vld [vmem:[%s3569_s30 + $0xe0] sm:$0xf] }
 0x151   : > { %v2507_v63 = vld [vmem:[%s3569_s30 + $0x40] sm:$0xf] }
 0x153   : > { %v428_v23 = vpop.xlane.xlu0 %427 }
 0x154   : > { %v439_v30 = vsub.f32 %v3525_v35, %v428_v23  ;;  %v2524_v35 = vor.u32 %v3143_v38, %v2523_v37  ;;  %v2403_v23 = vld [vmem:[%s3569_s30 + $0x98] sm:$0xf0]  ;;  %v3133_v37 = vld [vmem:[%s3569_s30 + $0x14] sm:$0xf0] }
 0x156   : > { %v3557_v1 = vpop.eup %3337  ;;  %v454_v34 = vmul.f32 1.442695, %v439_v30  ;;  %979 = vmatpush.bf16.msra.mxu3 %v2524_v35  ;;  %v3146_v30 = vld [vmem:[%s3569_s30 + $0x84] sm:$0xf]  ;;  %v2475_v35 = vld [vmem:[%s3569_s30] sm:$0xf] }
 0x157   : > { %631 = vperm.xlu2 %3320, %v3555_v0   ;;  %470 = vadd.xlane.f32.xlu0 %v3557_v1  ;;  %v2398_v33 = vor.u32 %v3146_v30, %v2395_v32  ;;  %v2476_v41 = vor.u32 %v3131_v39, %v2475_v35  ;;  %v3187_v30 = vld [vmem:[%s3569_s30 + $0x1c4] sm:$0xf0]  ;;  %v2613_v39 = vld [vmem:[%s3569_s30 + $0x178] sm:$0xf0] }
 0x158   : > { %3339 = vpow2.f32 %v454_v34  ;;  %v2483_v34 = vld [vmem:[%s3569_s30 + $0x10] sm:$0xf] }
 0x159   : > { %v2484_v38 = vor.u32 %v3133_v37, %v2483_v34  ;;  %v2643_v34 = vld [vmem:[%s3569_s30 + $0x190] sm:$0xf] }
 0x15a   : > { %980 = vmatpush.bf16.msra.mxu3 %v2516_v52  ;;  %v2611_v52 = vld [vmem:[%s3569_s30 + $0x170] sm:$0xf] }
 0x15b   : > { %v2612_v59 = vor.u32 %v3177_v55, %v2611_v52  ;;  %v2659_v52 = vld [vmem:[%s3569_s30 + $0x1b0] sm:$0xf] }
 0x15e   : > { %v3606_v60 = vpop.eup %3339 }
 0x15f   : > { %3323 = vset.pattern.permute.xlu2 %v3404_v45 }
 0x160   : > { %691 = vperm.xlu2 %3323, %v3485_v11   ;;  %v3159_v11 = vld [vmem:[%s3569_s30 + $0xe4] sm:$0xf0] }
 0x161   : > { %v2442_v21 = vor.u32 %v3159_v11, %v2441_v10  ;;  %v2414_v10 = vor.u32 %v3150_v6, %v2411_v9  ;;  %v2499_v11 = vld [vmem:[%s3569_s30 + $0x30] sm:$0xf]  ;;  %v2525_v6 = vld [vmem:[%s3569_s30 + $0x68] sm:$0xf0] }
 0x162   : > { %v2500_v16 = vor.u32 %v3137_v15, %v2499_v11  ;;  %v3175_v11 = vld [vmem:[%s3569_s30 + $0x164] sm:$0xf0]  ;;  %v2675_v15 = vld [vmem:[%s3569_s30 + $0x1d0] sm:$0xf] }
 0x163   : > { %851 = vmatpush.bf16.msra.mxu1 %v2442_v21  ;;  %v3148_v21 = vld [vmem:[%s3569_s30 + $0x94] sm:$0xf] }
 0x164   : > { %v2406_v24 = vor.u32 %v3148_v21, %v2403_v23  ;;  %v3140_v21 = vld [vmem:[%s3569_s30 + $0x54] sm:$0xf] }
 0x16b   : > { %626 = vperm.xlu0 %3321, %v599_v2  }
 0x173   : > { %3324 = vset.pattern.permute.xlu0 %v3404_v45  ;;  %v2427_v45 = vld [vmem:[%s3569_s30 + $0xc8] sm:$0xf0] }
 0x174   : > { %695 = vperm.xlu0 %3324, %v3500_v14   ;;  %v2433_v14 = vld [vmem:[%s3569_s30 + $0xd0] sm:$0xf]  ;;  %v2430_v47 = vor.u32 %v3154_v42, %v2427_v45  ;;  %v3636_v42 = vshrl.u32 %v403_v17, 7  ;;  %v3643_v45 = vstv %s516_s7 }
 0x175   : > { %v2434_v31 = vor.u32 %v3157_v26, %v2433_v14  ;;  %v3135_v14 = vld [vmem:[%s3569_s30 + $0x24] sm:$0xf0]  ;;  %v3653_v17 = vld [vmem:[%s4489_s3 + $0x30] sm:$0xff] }
 0x176   : > { %877 = vmatpush.bf16.msra.mxu2 %v2430_v47  ;;  %v2492_v26 = vor.u32 %v3135_v14, %v2491_v25  ;;  %v3645_v47 = vstv %s519_s8  ;;  %vm521_vm1 = vcmp.ge.s32.totalorder %v3636_v42, %v3643_v45  ;;  %v3173_v25 = vld [vmem:[%s3569_s30 + $0x154] sm:$0xf0]  ;;  %v2667_v14 = vld [vmem:[%s3569_s30 + $0x1c0] sm:$0xf] }
 0x177   : > { %852 = vmatpush.bf16.msra.mxu1 %v2434_v31  ;;  %v2394_v31 = vor.u32 %v3147_v28, %v2393_v27  ;;  %vm531_vm2 = vcmp.lt.s32.totalorder %v3636_v42, %v3645_v47  ;;  %v3699_v27 = vld [vmem:[%s4489_s3 + $0x38] sm:$0xff]  ;;  %v2668_v35 = vor.u32 %v3187_v30, %v2667_v14  ;;  %v3172_v14 = vld [vmem:[%s3569_s30 + $0x154] sm:$0xf] }
 0x178   : > { %vm3674_vm3 = vmand %vm521_vm1, %vm531_vm2 }
 0x17a   : > { %429 = vmax.xlane.f32.xlu1 %v3590_v29  ;;  %878 = vmatpush.bf16.msra.mxu2 %v2422_v61  ;;  %v3191_v61 = vld [vmem:[%s3569_s30 + $0x1e4] sm:$0xf0] }
 0x17b   : > { %853 = vmatpush.bf16.msra.mxu1 %v2426_v44  ;;  %v3641_v44 = vsel %vm405_vm0, %v3574_v7, -1e+30  ;;  %v2533_v7 = vld [vmem:[%s3569_s30 + $0x78] sm:$0xf0] }
 0x17c   : > { %703 = vperm.xlu0 %3324, %v599_v2   ;;  %v3139_v2 = vld [vmem:[%s3569_s30 + $0x44] sm:$0xf0]  ;;  %v2536_v53 = vor.u32 %v3144_v18, %v2533_v7 }
 0x17d   : > { %v2508_v3 = vor.u32 %v3139_v2, %v2507_v63  ;;  %v3171_v7 = vld [vmem:[%s3569_s30 + $0x144] sm:$0xf0] }
 0x17e   : > { %879 = vmatpush.bf16.msra.mxu2 %v2414_v10  ;;  %v2528_v10 = vor.u32 %v3142_v5, %v2525_v6  ;;  %v2501_v5 = vld [vmem:[%s3569_s30 + $0x38] sm:$0xf0] }
 0x17f   : > { %854 = vmatpush.bf16.msra.mxu1 %v2418_v57  ;;  %981 = vmatpush.bf16.msra.mxu3 %v2508_v3  ;;  %v507_v3 = vadd.s32 8, %v3636_v42 }
 0x181   : > { %vm522_vm4 = vcmp.ge.s32.totalorder %v507_v3, %v3643_v45  ;;  %vm532_vm5 = vcmp.lt.s32.totalorder %v507_v3, %v3645_v47 }
 0x182   : > { %880 = vmatpush.bf16.msra.mxu2 %v2406_v24  ;;  %v2595_v24 = vld [vmem:[%s3569_s30 + $0x150] sm:$0xf]  ;;  %vm3707_vm7 = vmand %vm522_vm4, %vm532_vm5  ;;  %vm1211_vm5 = vcmask 1045504  }
 0x183   : > { %855 = vmatpush.bf16.msra.mxu1 %v2410_v8  ;;  %982 = vmatpush.bf16.msra.mxu3 %v2500_v16  ;;  %v2603_v8 = vld [vmem:[%s3569_s30 + $0x160] sm:$0xf]  ;;  %v3189_v16 = vld [vmem:[%s3569_s30 + $0x1d4] sm:$0xf0]  ;;  %v2596_v28 = vor.u32 %v3173_v25, %v2595_v24  ;;  %vm2455_vm8 = vmpackc.low %vm3707_vm7, %vm3674_vm3 }
 0x184   : > { %v2604_v19 = vor.u32 %v3175_v11, %v2603_v8  ;;  %v2676_v20 = vor.u32 %v3189_v16, %v2675_v15  ;;  %v2579_v8 = vld [vmem:[%s3569_s30 + $0x130] sm:$0xf]  ;;  %v509_v15 = vadd.s32 24, %v3636_v42 }
 0x186   : > { %881 = vmatpush.bf16.msra.mxu2 %v2398_v33  ;;  %vm524_vm12 = vcmp.ge.s32.totalorder %v509_v15, %v3643_v45  ;;  %vm534_vm13 = vcmp.lt.s32.totalorder %v509_v15, %v3645_v47 }
 0x187   : > { %856 = vmatpush.bf16.msra.mxu1 %v2402_v22  ;;  %983 = vmatpush.bf16.msra.mxu3 %v2492_v26  ;;  %v2517_v22 = vld [vmem:[%s3569_s30 + $0x58] sm:$0xf0]  ;;  %vm3805_vm14 = vmand %vm524_vm12, %vm534_vm13 }
 0x188   : > { %v2520_v23 = vor.u32 %v3140_v21, %v2517_v22 }
 0x189   : > { %472 = vadd.xlane.f32.xlu2 %v3606_v60 }
 0x18a   : > { %1126 = vmatpush.bf16.msrb.mxu2 %v2612_v59  ;;  %v2605_v59 = vld [vmem:[%s3569_s30 + $0x168] sm:$0xf0] }
 0x18b   : > { %857 = vmatpush.bf16.msra.mxu1 %v2394_v31  ;;  %984 = vmatpush.bf16.msra.mxu3 %v2484_v38  ;;  %v3176_v31 = vld [vmem:[%s3569_s30 + $0x174] sm:$0xf]  ;;  %v508_v38 = vadd.s32 16, %v3636_v42 }
 0x18d   : > { %vm523_vm9 = vcmp.ge.s32.totalorder %v508_v38, %v3643_v45  ;;  %vm533_vm10 = vcmp.lt.s32.totalorder %v508_v38, %v3645_v47 }
 0x18e   : > { %1127 = vmatpush.bf16.msrb.mxu2 %v2604_v19  ;;  %v2651_v19 = vld [vmem:[%s3569_s30 + $0x1a0] sm:$0xf]  ;;  %vm3765_vm11 = vmand %vm523_vm9, %vm533_vm10  ;;  %vm658_vm9 = vcmask 1046528  }
 0x18f   : > { %985 = vmatpush.bf16.msra.mxu3 %v2476_v41  ;;  %1002 = vmatpush.bf16.msrb.mxu1 %v2536_v53  ;;  %v2616_v41 = vor.u32 %v3176_v31, %v2613_v39  ;;  %v3185_v53 = vld [vmem:[%s3569_s30 + $0x1b4] sm:$0xf0]  ;;  %v2652_v25 = vor.u32 %v3183_v4, %v2651_v19  ;;  %v3170_v39 = vld [vmem:[%s3569_s30 + $0x144] sm:$0xf]  ;;  %vm2458_vm15 = vmpackc.low %vm3805_vm14, %vm3765_vm11  ;;  %v510_v4 = vadd.s32 32, %v3636_v42 }
 0x191   : > { %vm525_vm0 = vcmp.ge.s32.totalorder %v510_v4, %v3643_v45  ;;  %vm535_vm1 = vcmp.lt.s32.totalorder %v510_v4, %v3645_v47 }
 0x192   : > { %1128 = vmatpush.bf16.msrb.mxu2 %v2596_v28  ;;  %v2571_v28 = vld [vmem:[%s3569_s30 + $0x120] sm:$0xf]  ;;  %vm3851_vm2 = vmand %vm525_vm0, %vm535_vm1 }
 0x193   : > { %699 = vperm.xlu1 %3322, %v3495_v13   ;;  %1003 = vmatpush.bf16.msrb.mxu1 %v2528_v10 }
 0x194   : > { %1150 = vmatpush.bf16.msrb.mxu3 %v2616_v41  ;;  %v2589_v41 = vld [vmem:[%s3569_s30 + $0x148] sm:$0xf0] }
 0x197   : > { %1004 = vmatpush.bf16.msrb.mxu1 %v2520_v23 }
 0x19b   : > { %3326 = vset.pattern.permute.xlu1 %v3403_v12 }
 0x1a1   : > { %707 = vperm.xlu2 %3323, %v3555_v0   ;;  %v3193_v0 = vld [vmem:[%s3569_s30 + $0x1f4] sm:$0xf0] }
 0x1a2   : > { %v461_v13 = vpop.xlane.xlu0 %460  ;;  %v2692_v50 = vor.u32 %v3193_v0, %v2691_v48  ;;  %v2509_v48 = vld [vmem:[%s3569_s30 + $0x48] sm:$0xf0]  ;;  %v2587_v0 = vld [vmem:[%s3569_s30 + $0x140] sm:$0xf] }
 0x1a3   : > { %3341 = vrcp.f32 %v461_v13  ;;  %v3138_v13 = vld [vmem:[%s3569_s30 + $0x44] sm:$0xf]  ;;  %v2588_v55 = vor.u32 %v3171_v7, %v2587_v0  ;;  %v2485_v0 = vld [vmem:[%s3569_s30 + $0x18] sm:$0xf0]  ;;  %v2563_v7 = vld [vmem:[%s3569_s30 + $0x110] sm:$0xf] }
 0x1a4   : > { %1302 = vmatpush.bf16.msrb.mxu0 %v2692_v50  ;;  %v2512_v18 = vor.u32 %v3138_v13, %v2509_v48  ;;  %v2592_v13 = vor.u32 %v3170_v39, %v2589_v41  ;;  %v3132_v48 = vld [vmem:[%s3569_s30 + $0x14] sm:$0xf]  ;;  %v3162_v39 = vld [vmem:[%s3569_s30 + $0x104] sm:$0xf] }
 0x1a5   : > { %1129 = vmatpush.bf16.msrb.mxu2 %v2588_v55 }
 0x1a6   : > { %431 = vmax.xlane.f32.xlu0 %v3641_v44  ;;  %1005 = vmatpush.bf16.msrb.mxu1 %v2512_v18  ;;  %v2488_v18 = vor.u32 %v3132_v48, %v2485_v0 }
 0x1a9   : > { %v3342_v57 = vpop.eup %3341  ;;  %3325 = vset.pattern.permute.xlu2 %v3403_v12  ;;  %v2684_v12 = vor.u32 %v3191_v61, %v2683_v56  ;;  %v2660_v56 = vor.u32 %v3185_v53, %v2659_v52  ;;  %v3165_v52 = vld [vmem:[%s3569_s30 + $0x114] sm:$0xf0]  ;;  %v2635_v53 = vld [vmem:[%s3569_s30 + $0x180] sm:$0xf] }
 0x1aa   : > { %v487_v63 = vmul.f32 0.16666667, %v3342_v57  ;;  %v463_v2 = vpop.xlane.xlu1 %462  ;;  %636 = vperm.xlu2 %3325, %v3653_v17   ;;  %v3174_v57 = vld [vmem:[%s3569_s30 + $0x164] sm:$0xf] }
 0x1ab   : > { %3343 = vrcp.f32 %v463_v2  ;;  %1303 = vmatpush.bf16.msrb.mxu0 %v2684_v12  ;;  %v3136_v12 = vld [vmem:[%s3569_s30 + $0x34] sm:$0xf] }
 0x1ac   : > { %v496_v9 = vmul.f32 %v3532_v43, %v487_v63  ;;  %v2608_v63 = vor.u32 %v3174_v57, %v2605_v59  ;;  %v2504_v6 = vor.u32 %v3136_v12, %v2501_v5  ;;  %v3179_v57 = vld [vmem:[%s3569_s30 + $0x184] sm:$0xf0]  ;;  %v3168_v59 = vld [vmem:[%s3569_s30 + $0x134] sm:$0xf] }
 0x1ad   : > { %v2636_v12 = vor.u32 %v3179_v57, %v2635_v53 }
 0x1ae   : > { %v3689_v43 = vsel %vm3674_vm3, %v496_v9, 0.0  ;;  %1151 = vmatpush.bf16.msrb.mxu3 %v2608_v63  ;;  %1006 = vmatpush.bf16.msrb.mxu1 %v2504_v6  ;;  %v3130_v6 = vld [vmem:[%s3569_s30 + $0x4] sm:$0xf] }
 0x1af   : > { %1304 = vmatpush.bf16.msrb.mxu0 %v2676_v20  ;;  %v568_v37 = vrot.slane %v3689_v43, 7 }
 0x1b1   : > { %v3344_v26 = vpop.eup %3343  ;;  %v594_v3 = vsel %vm567_vm6, 0.0, %v568_v37 }
 0x1b2   : > { %v488_v32 = vmul.f32 0.16666667, %v3344_v26  ;;  %v465_v33 = vpop.xlane.xlu2 %464  ;;  %641 = vperm.xlu2 %3325, %v3699_v27   ;;  %v649_v22 = vmul.f32 %v3528_v36, %v594_v3  ;;  %v2493_v26 = vld [vmem:[%s3569_s30 + $0x28] sm:$0xf0] }
 0x1b3   : > { %3345 = vrcp.f32 %v465_v33  ;;  %1305 = vmatpush.bf16.msrb.mxu0 %v2668_v35  ;;  %v3167_v33 = vld [vmem:[%s3569_s30 + $0x124] sm:$0xf0] }
 0x1b4   : > { %v497_v50 = vmul.f32 %v3537_v49, %v488_v32  ;;  %v2572_v38 = vor.u32 %v3167_v33, %v2571_v28 }
 0x1b6   : > { %v3730_v49 = vsel %vm3707_vm7, %v497_v50, 0.0  ;;  %v2456_v61 = vpack.c.bf16 %v497_v50, %v496_v9  ;;  %v3169_v9 = vld [vmem:[%s3569_s30 + $0x134] sm:$0xf0] }
 0x1b7   : > { %v569_v2 = vrot.slane %v3730_v49, 7  ;;  %1306 = vmatpush.bf16.msrb.mxu0 %v2660_v56  ;;  %v2580_v16 = vor.u32 %v3169_v9, %v2579_v8  ;;  %v2564_v56 = vor.u32 %v3165_v52, %v2563_v7  ;;  %v2477_v8 = vld [vmem:[%s3569_s30 + $0x8] sm:$0xf0] }
 0x1b8   : > { %2457 = vmatmul.msk.bf16.vlgmr.msra.gmra.mxu1 %vm2455_vm8, %v2456_v61  ;;  %2466 = vmatmul.msk.bf16.vlgmr.msra.gmra.mxu2 %vm2455_vm8, %v2456_v61  ;;  %v2581_v61 = vld [vmem:[%s3569_s30 + $0x138] sm:$0xf0] }
 0x1b9   : > { %v3346_v10 = vpop.eup %3345  ;;  %v570_v11 = vsel %vm567_vm6, %v568_v37, %v569_v2  ;;  %1130 = vmatpush.bf16.msrb.mxu2 %v2580_v16  ;;  %v3181_v37 = vld [vmem:[%s3569_s30 + $0x194] sm:$0xf0]  ;;  %v2584_v5 = vor.u32 %v3168_v59, %v2581_v61  ;;  %v3163_v16 = vld [vmem:[%s3569_s30 + $0x104] sm:$0xf0]  ;;  %v3192_v61 = vld [vmem:[%s3569_s30 + $0x1f4] sm:$0xf] }
 0x1ba   : > { %v489_v20 = vmul.f32 0.16666667, %v3346_v10  ;;  %v467_v21 = vpop.xlane.xlu0 %466  ;;  %711 = vperm.xlu0 %3324, %v3653_v17   ;;  %v3759_v23 = vmul.f32 %v3535_v46, %v570_v11  ;;  %v2597_v17 = vld [vmem:[%s3569_s30 + $0x158] sm:$0xf0]  ;;  %v3134_v46 = vld [vmem:[%s3569_s30 + $0x24] sm:$0xf]  ;;  %v2644_v35 = vor.u32 %v3181_v37, %v2643_v34  ;;  %v632_v57 = vpop.permute.xlu2 %631 }
 0x1bb   : > { %3347 = vrcp.f32 %v467_v21  ;;  %v2600_v36 = vor.u32 %v3172_v14, %v2597_v17  ;;  %v2496_v32 = vor.u32 %v3134_v46, %v2493_v26  ;;  %1307 = vmatpush.bf16.msrb.mxu0 %v2652_v25  ;;  %v2555_v11 = vld [vmem:[%s3569_s30 + $0x100] sm:$0xf]  ;;  %v2573_v21 = vld [vmem:[%s3569_s30 + $0x128] sm:$0xf0]  ;;  %v3164_v46 = vld [vmem:[%s3569_s30 + $0x114] sm:$0xf] }
 0x1bc   : > { %v498_v30 = vmul.f32 %v3542_v54, %v489_v20  ;;  %v3776_v31 = vpack.c.bf16 %v3759_v23, %v649_v22  ;;  %v2556_v19 = vor.u32 %v3163_v16, %v2555_v11  ;;  %v3166_v20 = vld [vmem:[%s3569_s30 + $0x124] sm:$0xf]  ;;  %v2565_v26 = vld [vmem:[%s3569_s30 + $0x118] sm:$0xf0] }
 0x1bd   : > { %1152 = vmatpush.bf16.msrb.mxu3 %v2600_v36  ;;  %1007 = vmatpush.bf16.msrb.mxu1 %v2496_v32  ;;  %v2576_v25 = vor.u32 %v3166_v20, %v2573_v21  ;;  %v3830_v14 = vld [vmem:[%s4489_s3 + $0x40] sm:$0xff]  ;;  %v2568_v32 = vor.u32 %v3164_v46, %v2565_v26  ;;  %v659_v21 = vrot.slane %v3689_v43, 1 }
 0x1be   : > { %986 = vmatmul.bf16.vlgmr.msra.gmra.mxu3 %v3776_v31  ;;  %v3786_v54 = vsel %vm3765_vm11, %v498_v30, 0.0  ;;  %1131 = vmatpush.bf16.msrb.mxu2 %v2572_v38  ;;  %v511_v38 = vadd.s32 40, %v3636_v42 }
 0x1bf   : > { %v1362_v50 = vpack.c.bf16 %v3786_v54, %v3730_v49  ;;  %1308 = vmatpush.bf16.msrb.mxu0 %v2644_v35  ;;  %v571_v10 = vrot.slane %v3786_v54, 7 }
 0x1c0   : > { %vm526_vm3 = vcmp.ge.s32.totalorder %v511_v38, %v3643_v45  ;;  %vm536_vm4 = vcmp.lt.s32.totalorder %v511_v38, %v3645_v47 }
 0x1c1   : > { %v3348_v55 = vpop.eup %3347  ;;  %1153 = vmatpush.bf16.msrb.mxu3 %v2592_v13  ;;  %1008 = vmatpush.bf16.msrb.mxu1 %v2488_v18  ;;  %v572_v17 = vsel %vm567_vm6, %v569_v2, %v571_v10  ;;  %v1387_v18 = vrot.slane %v1362_v50, 2  ;;  %vm3874_vm7 = vmand %vm526_vm3, %vm536_vm4 }
 0x1c2   : > { %v490_v63 = vmul.f32 0.16666667, %v3348_v55  ;;  %715 = vperm.xlu0 %3324, %v3699_v27   ;;  %v469_v9 = vpop.xlane.xlu0 %468  ;;  %1132 = vmatpush.bf16.msrb.mxu2 %v2564_v56  ;;  %v2480_v27 = vor.u32 %v3130_v6, %v2477_v8  ;;  %vm2461_vm8 = vmpackc.low %vm3874_vm7, %vm3851_vm2  ;;  %v3190_v8 = vld [vmem:[%s3569_s30 + $0x1e4] sm:$0xf] }
 0x1c3   : > { %3349 = vrcp.f32 %v469_v9  ;;  %1309 = vmatpush.bf16.msrb.mxu0 %v2636_v12  ;;  %v2685_v9 = vld [vmem:[%s3569_s30 + $0x1e8] sm:$0xf0] }
 0x1c4   : > { %v499_v15 = vmul.f32 %v3545_v58, %v490_v63  ;;  %v2693_v63 = vld [vmem:[%s3569_s30 + $0x1f8] sm:$0xf0] }
 0x1c5   : > { %1154 = vmatpush.bf16.msrb.mxu3 %v2584_v5  ;;  %1009 = vmatpush.bf16.msrb.mxu1 %v2480_v27  ;;  %v2696_v5 = vor.u32 %v3192_v61, %v2693_v63  ;;  %v2688_v27 = vor.u32 %v3190_v8, %v2685_v9  ;;  %v3208_v61 = vld [vmem:[%s3569_s30 + $0x274] sm:$0xf]  ;;  %v2653_v8 = vld [vmem:[%s3569_s30 + $0x1a8] sm:$0xf0] }
 0x1c6   : > { %v3824_v22 = vsel %vm3805_vm14, %v499_v15, 0.0  ;;  %v2459_v58 = vpack.c.bf16 %v499_v15, %v498_v30  ;;  %1133 = vmatpush.bf16.msrb.mxu2 %v2556_v19  ;;  %v3842_v30 = vmul.f32 %v3540_v51, %v572_v17  ;;  %v692_v17 = vpop.permute.xlu2 %691 }
 0x1c7   : > { %v573_v24 = vrot.slane %v3824_v22, 7 }
 0x1c8   : > { %2460 = vmatmul.msk.bf16.gmra.mxu1 %vm2458_vm15, %v2459_v58  ;;  %2469 = vmatmul.msk.bf16.gmra.mxu2 %vm2458_vm15, %v2459_v58  ;;  %v1186_v19 = vpack.c.bf16 %v3842_v30, %v3759_v23  ;;  %v3188_v58 = vld [vmem:[%s3569_s30 + $0x1d4] sm:$0xf] }
 0x1c9   : > { %v574_v36 = vsel %vm567_vm6, %v571_v10, %v573_v24  ;;  %1155 = vmatpush.bf16.msrb.mxu3 %v2576_v25  ;;  %v3350_v28 = vpop.eup %3349  ;;  %1326 = vmatpush.bf16.msra.mxu1 %v2696_v5  ;;  %v662_v10 = vrot.slane %v3786_v54, 1  ;;  %v2677_v25 = vld [vmem:[%s3569_s30 + $0x1d8] sm:$0xf0]  ;;  %v688_v54 = vpop.permute.xlu1 %687 }
 0x1ca   : > { %719 = vperm.xlu0 %3324, %v3830_v14   ;;  %v652_v2 = vmul.f32 %v3530_v40, %v574_v36  ;;  %v491_v33 = vmul.f32 0.16666667, %v3350_v28  ;;  %v471_v34 = vpop.xlane.xlu0 %470  ;;  %v2557_v40 = vld [vmem:[%s3569_s30 + $0x108] sm:$0xf0]  ;;  %v2680_v23 = vor.u32 %v3188_v58, %v2677_v25  ;;  %v1212_v26 = vrot.slane %v1186_v19, 2 }
 0x1cb   : > { %3351 = vrcp.f32 %v471_v34  ;;  %v2560_v41 = vor.u32 %v3162_v39, %v2557_v40  ;;  %v664_v28 = vrot.slane %v3824_v22, 1  ;;  %v2773_v5 = vld [vmem:[%s3569_s30 + $0x278] sm:$0xf0]  ;;  %v2765_v19 = vld [vmem:[%s3569_s30 + $0x268] sm:$0xf0] }
 0x1cc   : > { %v3846_v37 = vpack.c.bf16 %v652_v2, %v3842_v30  ;;  %v500_v51 = vmul.f32 %v3548_v62, %v491_v33  ;;  %v2669_v33 = vld [vmem:[%s3569_s30 + $0x1c8] sm:$0xf0]  ;;  %v2645_v58 = vld [vmem:[%s3569_s30 + $0x198] sm:$0xf0]  ;;  %v2755_v25 = vld [vmem:[%s3569_s30 + $0x250] sm:$0xf] }
 0x1cd   : > { %1156 = vmatpush.bf16.msrb.mxu3 %v2568_v32  ;;  %1327 = vmatpush.bf16.msra.mxu1 %v2688_v27  ;;  %v3207_v27 = vld [vmem:[%s3569_s30 + $0x264] sm:$0xf0] }
 0x1ce   : > { %991 = vmatmul.bf16.gmra.mxu3 %v3846_v37  ;;  %v3859_v13 = vpack.c.bf16 %v500_v51, %v499_v15  ;;  %v3863_v48 = vsel %vm3851_vm2, %v500_v51, 0.0  ;;  %v660_v15 = vrot.slane %v3730_v49, 1 }
 0x1cf   : > { %v1363_v62 = vpack.c.bf16 %v3863_v48, %v3824_v22 }
 0x1d0   : > { %v661_v46 = vsel %vm658_vm9, %v659_v21, %v660_v15  ;;  %v3180_v21 = vld [vmem:[%s3569_s30 + $0x194] sm:$0xf] }
 0x1d1   : > { %1157 = vmatpush.bf16.msrb.mxu3 %v2560_v41  ;;  %v3352_v0 = vpop.eup %3351  ;;  %v3872_v7 = vrot.slane %v1363_v62, 2  ;;  %1328 = vmatpush.bf16.msra.mxu1 %v2680_v23  ;;  %v722_v30 = vmul.f32 %v688_v54, %v661_v46  ;;  %v3184_v62 = vld [vmem:[%s3569_s30 + $0x1b4] sm:$0xf]  ;;  %v2757_v46 = vld [vmem:[%s3569_s30 + $0x258] sm:$0xf0] }
 0x1d2   : > { %v492_v52 = vmul.f32 0.16666667, %v3352_v0  ;;  %v2661_v0 = vld [vmem:[%s3569_s30 + $0x1b8] sm:$0xf0]  ;;  %v3204_v23 = vld [vmem:[%s3569_s30 + $0x254] sm:$0xf] }
 0x1d3   : > { %v3880_v55 = vsel %vm1211_vm5, %v1387_v18, %v3872_v7  ;;  %v2664_v18 = vor.u32 %v3184_v62, %v2661_v0  ;;  %v2749_v0 = vld [vmem:[%s3569_s30 + $0x248] sm:$0xf0] }
 0x1d4   : > { %v3883_v56 = vmul.f32 %v3557_v1, %v492_v52  ;;  %v575_v1 = vrot.slane %v3863_v48, 7 }
 0x1d6   : > { %v3892_v50 = vsel %vm3874_vm7, %v3883_v56, 0.0  ;;  %v2462_v59 = vpack.c.bf16 %v3883_v56, %v500_v51  ;;  %v576_v11 = vsel %vm567_vm6, %v573_v24, %v575_v1  ;;  %v663_v24 = vsel %vm658_vm9, %v660_v15, %v662_v10 }
 0x1d7   : > { %v577_v12 = vrot.slane %v3892_v50, 7  ;;  %v3924_v32 = vmul.f32 %v692_v17, %v663_v24  ;;  %v665_v51 = vsel %vm658_vm9, %v662_v10, %v664_v28  ;;  %v2648_v24 = vor.u32 %v3180_v21, %v2645_v58  ;;  %v3205_v17 = vld [vmem:[%s3569_s30 + $0x254] sm:$0xf0] }
 0x1d8   : > { %2463 = vmatmul.msk.bf16.gmra.mxu1 %vm2461_vm8, %v2462_v59  ;;  %2472 = vmatmul.msk.bf16.gmra.mxu2 %vm2461_vm8, %v2462_v59  ;;  %v3209_v59 = vld [vmem:[%s3569_s30 + $0x274] sm:$0xf0]  ;;  %v666_v58 = vrot.slane %v3863_v48, 1 }
 0x1d9   : > { %v578_v6 = vsel %vm567_vm6, %v575_v1, %v577_v12  ;;  %v1026_v40 = vpack.c.bf16 %v3924_v32, %v722_v30  ;;  %v2776_v1 = vor.u32 %v3208_v61, %v2773_v5  ;;  %v3178_v30 = vld [vmem:[%s3569_s30 + $0x184] sm:$0xf]  ;;  %v3200_v61 = vld [vmem:[%s3569_s30 + $0x234] sm:$0xf]  ;;  %v2741_v5 = vld [vmem:[%s3569_s30 + $0x238] sm:$0xf0] }
 0x1da   : > { %v3909_v20 = vmul.f32 %v632_v57, %v578_v6  ;;  %v2771_v57 = vld [vmem:[%s3569_s30 + $0x270] sm:$0xf]  ;;  %v3182_v6 = vld [vmem:[%s3569_s30 + $0x1a4] sm:$0xf] }
 0x1db   : > { %v2772_v63 = vor.u32 %v3209_v59, %v2771_v57  ;;  %v2656_v9 = vor.u32 %v3182_v6, %v2653_v8  ;;  %1501 = vmatpush.bf16.msra.mxu3 %v2776_v1  ;;  %v2739_v57 = vld [vmem:[%s3569_s30 + $0x230] sm:$0xf]  ;;  %v3201_v59 = vld [vmem:[%s3569_s30 + $0x234] sm:$0xf0]  ;;  %v2744_v1 = vor.u32 %v3200_v61, %v2741_v5  ;;  %v512_v6 = vadd.s32 48, %v3636_v42 }
 0x1dd   : > { %v627_v16 = vpop.permute.xlu0 %626  ;;  %1477 = vmatpush.bf16.msra.mxu2 %v2772_v63  ;;  %v2740_v63 = vor.u32 %v3201_v59, %v2739_v57  ;;  %vm527_vm10 = vcmp.ge.s32.totalorder %v512_v6, %v3643_v45  ;;  %vm537_vm11 = vcmp.lt.s32.totalorder %v512_v6, %v3645_v47 }
 0x1de   : > { %v653_v4 = vmul.f32 %v627_v16, %v576_v11  ;;  %v3206_v11 = vld [vmem:[%s3569_s30 + $0x264] sm:$0xf]  ;;  %vm3989_vm12 = vmand %vm527_vm10, %vm537_vm11 }
 0x1e0   : > { %v3915_v36 = vpack.c.bf16 %v653_v4, %v652_v2  ;;  %v3918_v49 = vpack.c.bf16 %v3909_v20, %v653_v4  ;;  %v3186_v2 = vld [vmem:[%s3569_s30 + $0x1c4] sm:$0xf]  ;;  %v2768_v4 = vor.u32 %v3206_v11, %v2765_v19  ;;  %v2723_v11 = vld [vmem:[%s3569_s30 + $0x210] sm:$0xf]  ;;  %v3196_v19 = vld [vmem:[%s3569_s30 + $0x214] sm:$0xf] }
 0x1e1   : > { %v2672_v38 = vor.u32 %v3186_v2, %v2669_v33  ;;  %v2637_v2 = vld [vmem:[%s3569_s30 + $0x188] sm:$0xf0] }
 0x1e2   : > { %996 = vmatmul.bf16.gmra.mxu3 %v3918_v49  ;;  %v1213_v43 = vrot.slane %v3915_v36, 2  ;;  %v2640_v33 = vor.u32 %v3178_v30, %v2637_v2  ;;  %v2715_v2 = vld [vmem:[%s3569_s30 + $0x200] sm:$0xf] }
 0x1e3   : > { %1329 = vmatpush.bf16.msra.mxu1 %v2672_v38  ;;  %1502 = vmatpush.bf16.msra.mxu3 %v2768_v4  ;;  %v2747_v38 = vld [vmem:[%s3569_s30 + $0x240] sm:$0xf]  ;;  %v2725_v4 = vld [vmem:[%s3569_s30 + $0x218] sm:$0xf0] }
 0x1e4   : > { %v3931_v34 = vsel %vm1211_vm5, %v1212_v26, %v1213_v43  ;;  %v2760_v26 = vor.u32 %v3204_v23, %v2757_v46 }
 0x1e5   : > { %1310 = vmatmul.bf16.vlgmr.msrb.gmra.mxu0 %v3931_v34 }
 0x1e6   : > { %v696_v39 = vpop.permute.xlu0 %695 }
 0x1e7   : > { %v3938_v41 = vmul.f32 %v696_v39, %v665_v51  ;;  %1330 = vmatpush.bf16.msra.mxu1 %v2664_v18  ;;  %v3203_v51 = vld [vmem:[%s3569_s30 + $0x244] sm:$0xf0]  ;;  %v3202_v39 = vld [vmem:[%s3569_s30 + $0x244] sm:$0xf]  ;;  %1503 = vmatpush.bf16.msra.mxu3 %v2760_v26  ;;  %v667_v26 = vsel %vm658_vm9, %v664_v28, %v666_v58 }
 0x1e8   : > { %1010 = vmatmul.bf16.vlgmr.msrb.gmra.mxu1 %v3776_v31  ;;  %1134 = vmatmul.bf16.vlgmr.msrb.gmra.mxu2 %v1026_v40  ;;  %v2763_v31 = vld [vmem:[%s3569_s30 + $0x260] sm:$0xf]  ;;  %v2748_v62 = vor.u32 %v3203_v51, %v2747_v38  ;;  %v2752_v18 = vor.u32 %v3202_v39, %v2749_v0  ;;  %v3194_v38 = vld [vmem:[%s3569_s30 + $0x204] sm:$0xf] }
 0x1e9   : > { %v1537_v52 = vpack.c.bf16 %v3938_v41, %v3924_v32  ;;  %v2764_v15 = vor.u32 %v3207_v27, %v2763_v31  ;;  %v2733_v27 = vld [vmem:[%s3569_s30 + $0x228] sm:$0xf0] }
 0x1eb   : > { %1331 = vmatpush.bf16.msra.mxu1 %v2656_v9  ;;  %1478 = vmatpush.bf16.msra.mxu2 %v2764_v15  ;;  %v3199_v9 = vld [vmem:[%s3569_s30 + $0x224] sm:$0xf0] }
 0x1ec   : > { %1504 = vmatpush.bf16.msra.mxu3 %v2752_v18  ;;  %v2717_v18 = vld [vmem:[%s3569_s30 + $0x208] sm:$0xf0] }
 0x1ed   : > { %v430_v10 = vpop.xlane.xlu1 %429  ;;  %v2720_v57 = vor.u32 %v3194_v38, %v2717_v18 }
 0x1ee   : > { %v440_v16 = vsub.f32 %v3590_v29, %v430_v10  ;;  %v2756_v29 = vor.u32 %v3205_v17, %v2755_v25  ;;  %v3198_v10 = vld [vmem:[%s3569_s30 + $0x224] sm:$0xf]  ;;  %v668_v25 = vrot.slane %v3892_v50, 1  ;;  %v704_v17 = vpop.permute.xlu0 %703 }
 0x1ef   : > { %1332 = vmatpush.bf16.msra.mxu1 %v2648_v24  ;;  %v2736_v15 = vor.u32 %v3198_v10, %v2733_v27 }
 0x1f0   : > { %v456_v54 = vmul.f32 1.442695, %v440_v16  ;;  %1479 = vmatpush.bf16.msra.mxu2 %v2756_v29  ;;  %1505 = vmatpush.bf16.msra.mxu3 %v2744_v1  ;;  %v3197_v16 = vld [vmem:[%s3569_s30 + $0x214] sm:$0xf0]  ;;  %v669_v48 = vsel %vm658_vm9, %v666_v58, %v668_v25 }
 0x1f1   : > { %v2724_v21 = vor.u32 %v3197_v16, %v2723_v11  ;;  %v726_v51 = vmul.f32 %v704_v17, %v669_v48  ;;  %v3224_v17 = vld [vmem:[%s3569_s30 + $0x2f4] sm:$0xf]  ;;  %v2853_v48 = vld [vmem:[%s3569_s30 + $0x2f8] sm:$0xf0] }
 0x1f2   : > { %3353 = vpow2.f32 %v456_v54  ;;  %1158 = vmatmul.bf16.vlgmr.msrb.gmra.mxu3 %v1026_v40  ;;  %v2728_v54 = vor.u32 %v3196_v19, %v2725_v4  ;;  %v2933_v4 = vld [vmem:[%s3569_s30 + $0x378] sm:$0xf0] }
 0x1f3   : > { %1333 = vmatpush.bf16.msra.mxu1 %v2640_v33  ;;  %v3195_v33 = vld [vmem:[%s3569_s30 + $0x204] sm:$0xf0] }
 0x1f4   : > { %1480 = vmatpush.bf16.msra.mxu2 %v2748_v62  ;;  %1506 = vmatpush.bf16.msra.mxu3 %v2736_v15  ;;  %v2716_v0 = vor.u32 %v3195_v33, %v2715_v2  ;;  %v3241_v15 = vld [vmem:[%s3569_s30 + $0x374] sm:$0xf0]  ;;  %v3239_v2 = vld [vmem:[%s3569_s30 + $0x364] sm:$0xf0]  ;;  %v3238_v33 = vld [vmem:[%s3569_s30 + $0x364] sm:$0xf] }
 0x1f8   : > { %v3968_v40 = vpop.eup %3353  ;;  %1015 = vmatmul.bf16.gmra.mxu1 %v3846_v37  ;;  %1481 = vmatpush.bf16.msra.mxu2 %v2740_v63  ;;  %v2731_v37 = vld [vmem:[%s3569_s30 + $0x220] sm:$0xf]  ;;  %v1562_v63 = vrot.slane %v1537_v52, 2 }
 0x1f9   : > { %474 = vadd.xlane.f32.xlu1 %v3968_v40  ;;  %v2732_v31 = vor.u32 %v3199_v9, %v2731_v37  ;;  %1507 = vmatpush.bf16.msra.mxu3 %v2728_v54  ;;  %v2851_v54 = vld [vmem:[%s3569_s30 + $0x2f0] sm:$0xf] }
 0x1fc   : > { %v473_v8 = vpop.xlane.xlu2 %472  ;;  %1482 = vmatpush.bf16.msra.mxu2 %v2732_v31 }
 0x1fd   : > { %3355 = vrcp.f32 %v473_v8  ;;  %1508 = vmatpush.bf16.msra.mxu3 %v2720_v57 }
 0x200   : > { %1483 = vmatpush.bf16.msra.mxu2 %v2724_v21 }
 0x203   : > { %v3356_v24 = vpop.eup %3355 }
 0x204   : > { %v493_v29 = vmul.f32 0.16666667, %v3356_v24  ;;  %v708_v46 = vpop.permute.xlu2 %707  ;;  %1484 = vmatpush.bf16.msra.mxu2 %v2716_v0  ;;  %v3225_v24 = vld [vmem:[%s3569_s30 + $0x2f4] sm:$0xf0] }
 0x205   : > { %v700_v30 = vpop.permute.xlu1 %699 }
 0x206   : > { %v502_v39 = vmul.f32 %v3606_v60, %v493_v29  ;;  %v725_v62 = vmul.f32 %v700_v30, %v667_v26  ;;  %v2856_v26 = vor.u32 %v3224_v17, %v2853_v48  ;;  %v2923_v30 = vld [vmem:[%s3569_s30 + $0x360] sm:$0xf] }
 0x207   : > { %v2924_v38 = vor.u32 %v3239_v2, %v2923_v30  ;;  %v2827_v48 = vld [vmem:[%s3569_s30 + $0x2c0] sm:$0xf]  ;;  %v3219_v2 = vld [vmem:[%s3569_s30 + $0x2c4] sm:$0xf0] }
 0x208   : > { %v4004_v59 = vsel %vm3989_vm12, %v502_v39, 0.0  ;;  %v4007_v22 = vpack.c.bf16 %v502_v39, %v3883_v56  ;;  %v4009_v28 = vpack.c.bf16 %v726_v51, %v725_v62  ;;  %v1027_v61 = vpack.c.bf16 %v725_v62, %v3938_v41  ;;  %1020 = vmatmul.bf16.gmra.mxu1 %v3918_v49  ;;  %v2843_v39 = vld [vmem:[%s3569_s30 + $0x2e0] sm:$0xf]  ;;  %v3223_v62 = vld [vmem:[%s3569_s30 + $0x2e4] sm:$0xf0] }
 0x209   : > { %v579_v60 = vrot.slane %v4004_v59, 7  ;;  %v670_v32 = vrot.slane %v4004_v59, 1  ;;  %1676 = vmatpush.bf16.msrb.mxu1 %v2856_v26  ;;  %v2844_v57 = vor.u32 %v3223_v62, %v2843_v39  ;;  %v2828_v39 = vor.u32 %v3219_v2, %v2827_v48  ;;  %v2883_v48 = vld [vmem:[%s3569_s30 + $0x310] sm:$0xf]  ;;  %v3228_v2 = vld [vmem:[%s3569_s30 + $0x314] sm:$0xf] }
 0x20a   : > { %v1563_v5 = vrot.slane %v4009_v28, 2  ;;  %1139 = vmatmul.bf16.gmra.mxu2 %v1027_v61  ;;  %1163 = vmatmul.bf16.gmra.mxu3 %v1027_v61  ;;  %v3222_v61 = vld [vmem:[%s3569_s30 + $0x2e4] sm:$0xf] }
 0x20b   : > { %v580_v56 = vsel %vm567_vm6, %v577_v12, %v579_v60  ;;  %v671_v6 = vsel %vm658_vm9, %v668_v25, %v670_v32 }
 0x20c   : > { %v637_v1 = vpop.permute.xlu2 %636  ;;  %v4026_v49 = vsel %vm1211_vm5, %v1562_v63, %v1563_v5  ;;  %v4042_v37 = vmul.f32 %v708_v46, %v671_v6  ;;  %v2852_v46 = vor.u32 %v3225_v24, %v2851_v54  ;;  %v2845_v63 = vld [vmem:[%s3569_s30 + $0x2e8] sm:$0xf0]  ;;  %v2915_v6 = vld [vmem:[%s3569_s30 + $0x350] sm:$0xf]  ;;  %v3235_v54 = vld [vmem:[%s3569_s30 + $0x344] sm:$0xf0] }
 0x20d   : > { %v655_v41 = vmul.f32 %v637_v1, %v580_v56  ;;  %v2848_v56 = vor.u32 %v3222_v61, %v2845_v63  ;;  %v3232_v61 = vld [vmem:[%s3569_s30 + $0x334] sm:$0xf] }
 0x20e   : > { %1652 = vmatpush.bf16.msra.mxu0 %v2852_v46  ;;  %v2909_v46 = vld [vmem:[%s3569_s30 + $0x348] sm:$0xf0] }
 0x20f   : > { %v4030_v52 = vpack.c.bf16 %v655_v41, %v3909_v20  ;;  %v1028_v20 = vpack.c.bf16 %v4042_v37, %v726_v51  ;;  %v2925_v51 = vld [vmem:[%s3569_s30 + $0x368] sm:$0xf0]  ;;  %1677 = vmatpush.bf16.msrb.mxu1 %v2848_v56 }
 0x210   : > { %v2928_v18 = vor.u32 %v3238_v33, %v2925_v51  ;;  %v3218_v33 = vld [vmem:[%s3569_s30 + $0x2c4] sm:$0xf] }
 0x211   : > { %v1215_v8 = vrot.slane %v4030_v52, 2 }
 0x212   : > { %646 = vperm.xlu1 %3326, %v3830_v14   ;;  %1653 = vmatpush.bf16.msra.mxu0 %v2844_v57  ;;  %v3233_v57 = vld [vmem:[%s3569_s30 + $0x334] sm:$0xf0] }
 0x213   : > { %v1216_v12 = vsel %vm1211_vm5, %v1213_v43, %v1215_v8 }
 0x214   : > { %1315 = vmatmul.bf16.gmra.mxu0 %v1216_v12 }
 0x218   : > { %1334 = vmatmul.bf16.vlgmr.msra.gmra.mxu1 %v3931_v34 }
 0x219   : > { %v432_v9 = vpop.xlane.xlu0 %431 }
 0x21a   : > { %v441_v10 = vsub.f32 %v3641_v44, %v432_v9  ;;  %1144 = vmatmul.bf16.gmra.mxu2 %v1028_v20  ;;  %1168 = vmatmul.bf16.gmra.mxu3 %v1028_v20  ;;  %v1364_v44 = vpack.c.bf16 %v4004_v59, %v3892_v50  ;;  %v3240_v50 = vld [vmem:[%s3569_s30 + $0x374] sm:$0xf] }
 0x21b   : > { %v2936_v21 = vor.u32 %v3240_v50, %v2933_v4  ;;  %v3236_v20 = vld [vmem:[%s3569_s30 + $0x354] sm:$0xf]  ;;  %v3221_v50 = vld [vmem:[%s3569_s30 + $0x2d4] sm:$0xf0] }
 0x21c   : > { %v458_v14 = vmul.f32 1.442695, %v441_v10  ;;  %v4054_v34 = vrot.slane %v1364_v44, 2  ;;  %v2917_v10 = vld [vmem:[%s3569_s30 + $0x358] sm:$0xf0] }
 0x21d   : > { %1834 = vmatpush.bf16.msrb.mxu3 %v2936_v21  ;;  %v2837_v21 = vld [vmem:[%s3569_s30 + $0x2d8] sm:$0xf0] }
 0x21e   : > { %3357 = vpow2.f32 %v458_v14  ;;  %v1391_v27 = vsel %vm1211_vm5, %v3872_v7, %v4054_v34  ;;  %v2920_v14 = vor.u32 %v3236_v20, %v2917_v10  ;;  %v3217_v20 = vld [vmem:[%s3569_s30 + $0x2b4] sm:$0xf0]  ;;  %v3216_v10 = vld [vmem:[%s3569_s30 + $0x2b4] sm:$0xf] }
 0x221   : > { %1835 = vmatpush.bf16.msrb.mxu3 %v2928_v18  ;;  %v2899_v18 = vld [vmem:[%s3569_s30 + $0x330] sm:$0xf] }
 0x222   : > { %v2900_v56 = vor.u32 %v3233_v57, %v2899_v18 }
 0x224   : > { %v4047_v31 = vpop.eup %3357 }
 0x225   : > { %476 = vadd.xlane.f32.xlu2 %v4047_v31  ;;  %1836 = vmatpush.bf16.msrb.mxu3 %v2920_v14  ;;  %v2821_v14 = vld [vmem:[%s3569_s30 + $0x2b8] sm:$0xf0] }
 0x228   : > { %1339 = vmatmul.bf16.gmra.mxu1 %v1216_v12  ;;  %v3237_v12 = vld [vmem:[%s3569_s30 + $0x354] sm:$0xf0] }
 0x229   : > { %v2916_v9 = vor.u32 %v3237_v12, %v2915_v6  ;;  %v2901_v6 = vld [vmem:[%s3569_s30 + $0x338] sm:$0xf0]  ;;  %v2819_v12 = vld [vmem:[%s3569_s30 + $0x2b0] sm:$0xf] }
 0x22a   : > { %1485 = vmatmul.bf16.vlgmr.msra.gmra.mxu2 %v3880_v55  ;;  %1509 = vmatmul.bf16.vlgmr.msra.gmra.mxu3 %v3880_v55  ;;  %v2931_v55 = vld [vmem:[%s3569_s30 + $0x370] sm:$0xf] }
 0x22b   : > { %v2932_v19 = vor.u32 %v3241_v15, %v2931_v55  ;;  %v2835_v15 = vld [vmem:[%s3569_s30 + $0x2d0] sm:$0xf] }
 0x22c   : > { %v2836_v4 = vor.u32 %v3221_v50, %v2835_v15  ;;  %v2820_v15 = vor.u32 %v3217_v20, %v2819_v12  ;;  %v3231_v50 = vld [vmem:[%s3569_s30 + $0x324] sm:$0xf0]  ;;  %v2803_v20 = vld [vmem:[%s3569_s30 + $0x290] sm:$0xf] }
 0x22d   : > { %1810 = vmatpush.bf16.msrb.mxu2 %v2932_v19  ;;  %v3220_v19 = vld [vmem:[%s3569_s30 + $0x2d4] sm:$0xf] }
 0x22e   : > { %v2840_v24 = vor.u32 %v3220_v19, %v2837_v21  ;;  %1654 = vmatpush.bf16.msra.mxu0 %v2836_v4  ;;  %v3230_v19 = vld [vmem:[%s3569_s30 + $0x324] sm:$0xf]  ;;  %v2893_v4 = vld [vmem:[%s3569_s30 + $0x328] sm:$0xf0]  ;;  %v2824_v21 = vor.u32 %v3216_v10, %v2821_v14  ;;  %v3212_v10 = vld [vmem:[%s3569_s30 + $0x294] sm:$0xf] }
 0x230   : > { %1678 = vmatpush.bf16.msrb.mxu1 %v2840_v24  ;;  %v3215_v24 = vld [vmem:[%s3569_s30 + $0x2a4] sm:$0xf0] }
 0x231   : > { %1811 = vmatpush.bf16.msrb.mxu2 %v2924_v38  ;;  %v2829_v38 = vld [vmem:[%s3569_s30 + $0x2c8] sm:$0xf0] }
 0x232   : > { %v2832_v62 = vor.u32 %v3218_v33, %v2829_v38  ;;  %1655 = vmatpush.bf16.msra.mxu0 %v2828_v39  ;;  %v2885_v39 = vld [vmem:[%s3569_s30 + $0x318] sm:$0xf0] }
 0x234   : > { %1679 = vmatpush.bf16.msrb.mxu1 %v2832_v62 }
 0x235   : > { %v859_v43 = vpop.f32.mrf.mxu1  ;;  %1812 = vmatpush.bf16.msrb.mxu2 %v2916_v9  ;;  %v2904_v9 = vor.u32 %v3232_v61, %v2901_v6  ;;  %v2888_v6 = vor.u32 %v3228_v2, %v2885_v39  ;;  %v3211_v2 = vld [vmem:[%s3569_s30 + $0x284] sm:$0xf0] }
 0x236   : > { %1656 = vmatpush.bf16.msra.mxu0 %v2820_v15  ;;  %v2875_v15 = vld [vmem:[%s3569_s30 + $0x300] sm:$0xf] }
 0x238   : > { %1680 = vmatpush.bf16.msrb.mxu1 %v2824_v21  ;;  %v2877_v21 = vld [vmem:[%s3569_s30 + $0x308] sm:$0xf0] }
 0x23a   : > { %1490 = vmatmul.bf16.gmra.mxu2 %v1391_v27  ;;  %1514 = vmatmul.bf16.gmra.mxu3 %v1391_v27 }
 0x23b   : > { %v4059_v11 = vpop.f32.mrf.mxu2 }
 0x23d   : > { %v4061_v16 = vpop.f32.mrf.mxu1 }
 0x241   : > { %v987_v7 = vpop.f32.mrf.mxu3 }
 0x242   : > { %v4067_v58 = vadd.f32 %v987_v7, %v859_v43  ;;  %v2907_v7 = vld [vmem:[%s3569_s30 + $0x340] sm:$0xf] }
 0x243   : > { %v4069_v25 = vpop.f32.mrf.mxu2  ;;  %v2908_v17 = vor.u32 %v3235_v54, %v2907_v7  ;;  %v2811_v54 = vld [vmem:[%s3569_s30 + $0x2a0] sm:$0xf] }
 0x244   : > { %v2812_v38 = vor.u32 %v3215_v24, %v2811_v54 }
 0x245   : > { %v864_v29 = vpop.f32.mrf.mxu1  ;;  %1813 = vmatpush.bf16.msrb.mxu2 %v2908_v17  ;;  %v2896_v17 = vor.u32 %v3230_v19, %v2893_v4  ;;  %v3226_v4 = vld [vmem:[%s3569_s30 + $0x304] sm:$0xf] }
 0x246   : > { %1657 = vmatpush.bf16.msra.mxu0 %v2812_v38  ;;  %v3210_v38 = vld [vmem:[%s3569_s30 + $0x284] sm:$0xf] }
 0x249   : > { %v4081_v0 = vpop.f32.mrf.mxu3  ;;  %1814 = vmatpush.bf16.msrb.mxu2 %v2900_v56 }
 0x24b   : > { %v4085_v1 = vpop.f32.mrf.mxu2 }
 0x24d   : > { %v4087_v41 = vpop.f32.mrf.mxu1 }
 0x251   : > { %v992_v44 = vpop.f32.mrf.mxu3 }
 0x252   : > { %v4093_v43 = vadd.f32 %v992_v44, %v864_v29  ;;  %v3234_v29 = vld [vmem:[%s3569_s30 + $0x344] sm:$0xf]  ;;  %v2891_v44 = vld [vmem:[%s3569_s30 + $0x320] sm:$0xf] }
 0x253   : > { %v4095_v27 = vpop.f32.mrf.mxu2  ;;  %v2912_v30 = vor.u32 %v3234_v29, %v2909_v46  ;;  %v2892_v7 = vor.u32 %v3231_v50, %v2891_v44  ;;  %v3214_v29 = vld [vmem:[%s3569_s30 + $0x2a4] sm:$0xf]  ;;  %v2813_v46 = vld [vmem:[%s3569_s30 + $0x2a8] sm:$0xf0]  ;;  %v2805_v44 = vld [vmem:[%s3569_s30 + $0x298] sm:$0xf0] }
 0x254   : > { %v2816_v18 = vor.u32 %v3214_v29, %v2813_v46  ;;  %v3227_v50 = vld [vmem:[%s3569_s30 + $0x304] sm:$0xf0]  ;;  %v513_v46 = vadd.s32 56, %v3636_v42 }
 0x255   : > { %v4097_v55 = vpop.f32.mrf.mxu1  ;;  %1837 = vmatpush.bf16.msrb.mxu3 %v2912_v30  ;;  %v3229_v30 = vld [vmem:[%s3569_s30 + $0x314] sm:$0xf0]  ;;  %1815 = vmatpush.bf16.msrb.mxu2 %v2892_v7  ;;  %v2876_v19 = vor.u32 %v3227_v50, %v2875_v15  ;;  %v3011_v15 = vld [vmem:[%s3569_s30 + $0x3f0] sm:$0xf] }
 0x256   : > { %v2884_v57 = vor.u32 %v3229_v30, %v2883_v48  ;;  %1681 = vmatpush.bf16.msrb.mxu1 %v2816_v18  ;;  %v2795_v30 = vld [vmem:[%s3569_s30 + $0x280] sm:$0xf]  ;;  %v2797_v18 = vld [vmem:[%s3569_s30 + $0x288] sm:$0xf0]  ;;  %vm528_vm13 = vcmp.ge.s32.totalorder %v513_v46, %v3643_v45  ;;  %vm538_vm15 = vcmp.lt.s32.totalorder %v513_v46, %v3645_v47  ;;  %v3257_v50 = vld [vmem:[%s3569_s30 + $0x3f4] sm:$0xf0] }
 0x257   : > { %vm4179_vm0 = vmand %vm528_vm13, %vm538_vm15  ;;  %v3101_v46 = vld [vmem:[%s3569_s30 + $0x460] sm:$0xf] }
 0x259   : > { %v4113_v51 = vpop.f32.mrf.mxu3  ;;  %1838 = vmatpush.bf16.msrb.mxu3 %v2904_v9  ;;  %v3213_v9 = vld [vmem:[%s3569_s30 + $0x294] sm:$0xf0]  ;;  %1816 = vmatpush.bf16.msrb.mxu2 %v2884_v57 }
 0x25a   : > { %v2804_v14 = vor.u32 %v3213_v9, %v2803_v20  ;;  %v3273_v57 = vld [vmem:[%s3569_s30 + $0x474] sm:$0xf0]  ;;  %v3272_v20 = vld [vmem:[%s3569_s30 + $0x474] sm:$0xf]  ;;  %v3111_v9 = vld [vmem:[%s3569_s30 + $0x478] sm:$0xf0] }
 0x25b   : > { %v4108_v26 = vpop.f32.mrf.mxu2 }
 0x25c   : > { %1658 = vmatpush.bf16.msra.mxu0 %v2804_v14 }
 0x25d   : > { %v4118_v63 = vpop.f32.mrf.mxu1  ;;  %1839 = vmatpush.bf16.msrb.mxu3 %v2896_v17  ;;  %1817 = vmatpush.bf16.msrb.mxu2 %v2876_v19 }
 0x261   : > { %1840 = vmatpush.bf16.msrb.mxu3 %v2888_v6 }
 0x262   : > { %v1311_v7 = vpop.f32.mrf.mxu0 }
 0x263   : > { %v4136_v33 = vpop.f32.mrf.mxu2 }
 0x265   : > { %v997_v62 = vpop.f32.mrf.mxu3  ;;  %v1011_v56 = vpop.f32.mrf.mxu1 }
 0x266   : > { %v4140_v61 = vadd.f32 %v997_v62, %v4097_v55  ;;  %v4143_v12 = vadd.f32 %v1011_v56, %v4059_v11  ;;  %v2808_v55 = vor.u32 %v3212_v10, %v2805_v44  ;;  %v2880_v11 = vor.u32 %v3226_v4, %v2877_v21 }
 0x267   : > { %v2796_v62 = vor.u32 %v3211_v2, %v2795_v30  ;;  %v2800_v56 = vor.u32 %v3210_v38, %v2797_v18  ;;  %v3114_v10 = vor.u32 %v3272_v20, %v3111_v9  ;;  %v990_v44 = vadd.f32 %v4081_v0, %v4061_v16  ;;  %v3270_v18 = vld [vmem:[%s3569_s30 + $0x464] sm:$0xf]  ;;  %v642_v20 = vpop.permute.xlu2 %641 }
 0x268   : > { %1682 = vmatpush.bf16.msrb.mxu1 %v2808_v55  ;;  %1841 = vmatpush.bf16.msrb.mxu3 %v2880_v11  ;;  %v3256_v55 = vld [vmem:[%s3569_s30 + $0x3f4] sm:$0xf]  ;;  %v3012_v21 = vor.u32 %v3257_v50, %v3011_v15  ;;  %v3013_v11 = vld [vmem:[%s3569_s30 + $0x3f8] sm:$0xf0] }
 0x269   : > { %1659 = vmatpush.bf16.msra.mxu0 %v2796_v62  ;;  %v3271_v62 = vld [vmem:[%s3569_s30 + $0x464] sm:$0xf0] }
 0x26b   : > { %v1135_v54 = vpop.f32.mrf.mxu2 }
 0x26c   : > { %v475_v24 = vpop.xlane.xlu1 %474  ;;  %v1174_v17 = vadd.f32 %v1135_v54, %v4067_v58  ;;  %v3109_v58 = vld [vmem:[%s3569_s30 + $0x470] sm:$0xf]  ;;  %1683 = vmatpush.bf16.msrb.mxu1 %v2800_v56  ;;  %2150 = vmatpush.bf16.msra.mxu3 %v3114_v10  ;;  %v3016_v54 = vor.u32 %v3256_v55, %v3013_v11  ;;  %v3103_v56 = vld [vmem:[%s3569_s30 + $0x468] sm:$0xf0] }
 0x26d   : > { %3359 = vrcp.f32 %v475_v24  ;;  %v4154_v29 = vpop.f32.mrf.mxu3  ;;  %v1013_v48 = vpop.f32.mrf.mxu1  ;;  %v3110_v6 = vor.u32 %v3273_v57, %v3109_v58  ;;  %1968 = vmatpush.bf16.msrb.mxu0 %v3012_v21  ;;  %v3254_v21 = vld [vmem:[%s3569_s30 + $0x3e4] sm:$0xf] }
 0x26e   : > { %v4160_v39 = vadd.f32 %v1311_v7, %v1174_v17  ;;  %v1313_v24 = vpop.f32.mrf.mxu0  ;;  %v1000_v7 = vadd.f32 %v4154_v29, %v4118_v63 }
 0x26f   : > { %2126 = vmatpush.bf16.msra.mxu2 %v3110_v6 }
 0x270   : > { %1992 = vmatpush.bf16.msra.mxu1 %v3016_v54  ;;  %v3093_v54 = vld [vmem:[%s3569_s30 + $0x450] sm:$0xf] }
 0x273   : > { %v3360_v14 = vpop.eup %3359  ;;  %v1137_v4 = vpop.f32.mrf.mxu2 }
 0x274   : > { %v494_v19 = vmul.f32 0.16666667, %v3360_v14  ;;  %v1176_v16 = vadd.f32 %v1137_v4, %v990_v44  ;;  %v1014_v14 = vadd.f32 %v1013_v48, %v4069_v25  ;;  %v3255_v4 = vld [vmem:[%s3569_s30 + $0x3e4] sm:$0xf0] }
 0x275   : > { %v1159_v0 = vpop.f32.mrf.mxu3  ;;  %v1016_v30 = vpop.f32.mrf.mxu1 }
 0x276   : > { %v4184_v17 = vmul.f32 %v3968_v40, %v494_v19  ;;  %v4187_v2 = vadd.f32 %v1159_v0, %v4143_v12  ;;  %v4190_v38 = vadd.f32 %v1016_v30, %v4085_v1  ;;  %v4195_v58 = vadd.f32 %v1313_v24, %v1176_v16  ;;  %v3005_v0 = vld [vmem:[%s3569_s30 + $0x3e8] sm:$0xf0]  ;;  %v3269_v24 = vld [vmem:[%s3569_s30 + $0x454] sm:$0xf0] }
 0x277   : > { %v3102_v40 = vor.u32 %v3271_v62, %v3101_v46  ;;  %v3106_v1 = vor.u32 %v3270_v18, %v3103_v56  ;;  %v3094_v46 = vor.u32 %v3269_v24, %v3093_v54  ;;  %v3268_v62 = vld [vmem:[%s3569_s30 + $0x454] sm:$0xf]  ;;  %v3095_v18 = vld [vmem:[%s3569_s30 + $0x458] sm:$0xf0] }
 0x278   : > { %v4200_v57 = vsel %vm4179_vm0, %v4184_v17, 0.0  ;;  %v3098_v56 = vor.u32 %v3268_v62, %v3095_v18  ;;  %v3264_v54 = vld [vmem:[%s3569_s30 + $0x434] sm:$0xf]  ;;  %v3079_v18 = vld [vmem:[%s3569_s30 + $0x438] sm:$0xf0] }
 0x279   : > { %v581_v12 = vrot.slane %v4200_v57, 7  ;;  %v1365_v6 = vpack.c.bf16 %v4200_v57, %v4200_v57  ;;  %2127 = vmatpush.bf16.msra.mxu2 %v3102_v40  ;;  %2151 = vmatpush.bf16.msra.mxu3 %v3106_v1  ;;  %v2995_v40 = vld [vmem:[%s3569_s30 + $0x3d0] sm:$0xf]  ;;  %v3252_v1 = vld [vmem:[%s3569_s30 + $0x3d4] sm:$0xf] }
 0x27b   : > { %v1392_v9 = vrot.slane %v1365_v6, 2  ;;  %v582_v10 = vsel %vm567_vm6, %v579_v60, %v581_v12  ;;  %v3253_v6 = vld [vmem:[%s3569_s30 + $0x3d4] sm:$0xf0] }
 0x27c   : > { %v4212_v44 = vmul.f32 %v642_v20, %v582_v10  ;;  %v2997_v20 = vld [vmem:[%s3569_s30 + $0x3d8] sm:$0xf0]  ;;  %v3085_v10 = vld [vmem:[%s3569_s30 + $0x440] sm:$0xf] }
 0x27d   : > { %v1161_v15 = vpop.f32.mrf.mxu3  ;;  %v1393_v50 = vsel %vm1211_vm5, %v4054_v34, %v1392_v9  ;;  %v4216_v55 = vpop.f32.mrf.mxu1  ;;  %v3003_v34 = vld [vmem:[%s3569_s30 + $0x3e0] sm:$0xf]  ;;  %2128 = vmatpush.bf16.msra.mxu2 %v3094_v46  ;;  %v3000_v9 = vor.u32 %v3252_v1, %v2997_v20  ;;  %2152 = vmatpush.bf16.msra.mxu3 %v3098_v56  ;;  %v3249_v56 = vld [vmem:[%s3569_s30 + $0x3b4] sm:$0xf0] }
 0x27e   : > { %v4218_v19 = vadd.f32 %v1161_v15, %v1014_v14  ;;  %1495 = vmatmul.bf16.gmra.mxu2 %v1393_v50  ;;  %1519 = vmatmul.bf16.gmra.mxu3 %v1393_v50  ;;  %v1189_v60 = vpack.c.bf16 %v4212_v44, %v4212_v44  ;;  %v3004_v16 = vor.u32 %v3255_v4, %v3003_v34  ;;  %v3267_v14 = vld [vmem:[%s3569_s30 + $0x444] sm:$0xf0]  ;;  %v3266_v15 = vld [vmem:[%s3569_s30 + $0x444] sm:$0xf] }
 0x27f   : > { %v3086_v50 = vor.u32 %v3267_v14, %v3085_v10  ;;  %v3250_v4 = vld [vmem:[%s3569_s30 + $0x3c4] sm:$0xf]  ;;  %v2981_v10 = vld [vmem:[%s3569_s30 + $0x3b8] sm:$0xf0]  ;;  %v3069_v14 = vld [vmem:[%s3569_s30 + $0x420] sm:$0xf] }
 0x280   : > { %v1217_v25 = vrot.slane %v1189_v60, 2  ;;  %1969 = vmatpush.bf16.msrb.mxu0 %v3004_v16  ;;  %v3087_v60 = vld [vmem:[%s3569_s30 + $0x448] sm:$0xf0] }
 0x281   : > { %v3090_v34 = vor.u32 %v3266_v15, %v3087_v60  ;;  %2129 = vmatpush.bf16.msra.mxu2 %v3086_v50  ;;  %v3263_v15 = vld [vmem:[%s3569_s30 + $0x424] sm:$0xf0]  ;;  %v3082_v50 = vor.u32 %v3264_v54, %v3079_v18  ;;  %v3061_v54 = vld [vmem:[%s3569_s30 + $0x410] sm:$0xf] }
 0x282   : > { %v1218_v48 = vsel %vm1211_vm5, %v1215_v8, %v1217_v25  ;;  %v3008_v8 = vor.u32 %v3254_v21, %v3005_v0  ;;  %v2987_v25 = vld [vmem:[%s3569_s30 + $0x3c0] sm:$0xf]  ;;  %v2989_v21 = vld [vmem:[%s3569_s30 + $0x3c8] sm:$0xf0]  ;;  %v3265_v0 = vld [vmem:[%s3569_s30 + $0x434] sm:$0xf0] }
 0x283   : > { %1320 = vmatmul.bf16.gmra.mxu0 %v1218_v48  ;;  %1344 = vmatmul.bf16.gmra.mxu1 %v1218_v48  ;;  %v3251_v48 = vld [vmem:[%s3569_s30 + $0x3c4] sm:$0xf0]  ;;  %v2992_v46 = vor.u32 %v3250_v4, %v2989_v21  ;;  %v2971_v4 = vld [vmem:[%s3569_s30 + $0x3a0] sm:$0xf] }
 0x284   : > { %1993 = vmatpush.bf16.msra.mxu1 %v3008_v8  ;;  %v2988_v16 = vor.u32 %v3251_v48, %v2987_v25  ;;  %2153 = vmatpush.bf16.msra.mxu3 %v3090_v34  ;;  %v3071_v48 = vld [vmem:[%s3569_s30 + $0x428] sm:$0xf0]  ;;  %v3247_v21 = vld [vmem:[%s3569_s30 + $0x3a4] sm:$0xf0] }
 0x285   : > { %v1021_v11 = vpop.f32.mrf.mxu1 }
 0x286   : > { %v4232_v30 = vadd.f32 %v1021_v11, %v4108_v26  ;;  %v2996_v26 = vor.u32 %v3253_v6, %v2995_v40  ;;  %v3077_v11 = vld [vmem:[%s3569_s30 + $0x430] sm:$0xf]  ;;  %v672_v6 = vrot.slane %v4200_v57, 1 }
 0x287   : > { %v3078_v62 = vor.u32 %v3265_v0, %v3077_v11  ;;  %v2979_v40 = vld [vmem:[%s3569_s30 + $0x3b0] sm:$0xf]  ;;  %v2973_v0 = vld [vmem:[%s3569_s30 + $0x3a8] sm:$0xf0] }
 0x288   : > { %1970 = vmatpush.bf16.msrb.mxu0 %v2996_v26  ;;  %1994 = vmatpush.bf16.msra.mxu1 %v3000_v9  ;;  %v3248_v9 = vld [vmem:[%s3569_s30 + $0x3b4] sm:$0xf]  ;;  %v673_v34 = vsel %vm658_vm9, %v670_v32, %v672_v6  ;;  %v2972_v32 = vor.u32 %v3247_v21, %v2971_v4 }
 0x289   : > { %2130 = vmatpush.bf16.msra.mxu2 %v3078_v62  ;;  %v2984_v25 = vor.u32 %v3248_v9, %v2981_v10  ;;  %2154 = vmatpush.bf16.msra.mxu3 %v3082_v50  ;;  %v2963_v10 = vld [vmem:[%s3569_s30 + $0x390] sm:$0xf] }
 0x28c   : > { %1971 = vmatpush.bf16.msrb.mxu0 %v2988_v16  ;;  %1995 = vmatpush.bf16.msra.mxu1 %v2992_v46  ;;  %v3246_v16 = vld [vmem:[%s3569_s30 + $0x3a4] sm:$0xf]  ;;  %v1019_v46 = vadd.f32 %v4216_v55, %v4095_v27  ;;  %v3063_v27 = vld [vmem:[%s3569_s30 + $0x418] sm:$0xf0] }
 0x28d   : > { %v1140_v24 = vpop.f32.mrf.mxu2  ;;  %v1164_v8 = vpop.f32.mrf.mxu3 }
 0x28e   : > { %v4255_v1 = vpop.f32.mrf.mxu1  ;;  %v1178_v20 = vadd.f32 %v1140_v24, %v4093_v43  ;;  %v4259_v26 = vadd.f32 %v1164_v8, %v4190_v38  ;;  %1818 = vmatmul.bf16.vlgmr.msrb.gmra.mxu2 %v3915_v36  ;;  %1842 = vmatmul.bf16.vlgmr.msrb.gmra.mxu3 %v3915_v36  ;;  %v2980_v43 = vor.u32 %v3249_v56, %v2979_v40  ;;  %v3262_v38 = vld [vmem:[%s3569_s30 + $0x424] sm:$0xf]  ;;  %v3261_v24 = vld [vmem:[%s3569_s30 + $0x414] sm:$0xf0]  ;;  %v712_v8 = vpop.permute.xlu0 %711 }
 0x28f   : > { %v3070_v36 = vor.u32 %v3263_v15, %v3069_v14  ;;  %v3074_v59 = vor.u32 %v3262_v38, %v3071_v48  ;;  %v728_v18 = vmul.f32 %v712_v8, %v673_v34  ;;  %v2976_v40 = vor.u32 %v3246_v16, %v2973_v0  ;;  %v3245_v14 = vld [vmem:[%s3569_s30 + $0x394] sm:$0xf0]  ;;  %v3244_v15 = vld [vmem:[%s3569_s30 + $0x394] sm:$0xf]  ;;  %v3053_v38 = vld [vmem:[%s3569_s30 + $0x400] sm:$0xf] }
 0x290   : > { %1972 = vmatpush.bf16.msrb.mxu0 %v2980_v43  ;;  %1996 = vmatpush.bf16.msra.mxu1 %v2984_v25  ;;  %v3062_v56 = vor.u32 %v3261_v24, %v3061_v54  ;;  %v2965_v43 = vld [vmem:[%s3569_s30 + $0x398] sm:$0xf0]  ;;  %v514_v25 = vadd.s32 64, %v3636_v42  ;;  %v2964_v4 = vor.u32 %v3245_v14, %v2963_v10  ;;  %v3258_v16 = vld [vmem:[%s3569_s30 + $0x404] sm:$0xf]  ;;  %v647_v10 = vpop.permute.xlu1 %646 }
 0x291   : > { %v1316_v60 = vpop.f32.mrf.mxu0  ;;  %2131 = vmatpush.bf16.msra.mxu2 %v3070_v36  ;;  %2155 = vmatpush.bf16.msra.mxu3 %v3074_v59  ;;  %v4303_v21 = vpack.c.bf16 %v728_v18, %v4042_v37  ;;  %v3055_v0 = vld [vmem:[%s3569_s30 + $0x408] sm:$0xf0]  ;;  %v3242_v18 = vld [vmem:[%s3569_s30 + $0x384] sm:$0xf] }
 0x292   : > { %v4271_v11 = vadd.f32 %v1316_v60, %v1178_v20  ;;  %v3260_v20 = vld [vmem:[%s3569_s30 + $0x414] sm:$0xf]  ;;  %v3259_v60 = vld [vmem:[%s3569_s30 + $0x404] sm:$0xf0]  ;;  %v3058_v42 = vor.u32 %v3258_v16, %v3055_v0  ;;  %vm529_vm1 = vcmp.ge.s32.totalorder %v514_v25, %v3643_v45  ;;  %vm539_vm3 = vcmp.lt.s32.totalorder %v514_v25, %v3645_v47 }
 0x293   : > { %1660 = vmatmul.bf16.vlgmr.msra.gmra.mxu0 %v4026_v49  ;;  %1684 = vmatmul.bf16.vlgmr.msrb.gmra.mxu1 %v4026_v49  ;;  %v3066_v48 = vor.u32 %v3260_v20, %v3063_v27  ;;  %v3054_v34 = vor.u32 %v3259_v60, %v3053_v38  ;;  %v1565_v37 = vrot.slane %v4303_v21, 2  ;;  %v2957_v27 = vld [vmem:[%s3569_s30 + $0x388] sm:$0xf0]  ;;  %vm4327_vm4 = vmand %vm529_vm1, %vm539_vm3  ;;  %v1024_v47 = vadd.f32 %v4255_v1, %v4136_v33 }
 0x294   : > { %1973 = vmatpush.bf16.msrb.mxu0 %v2972_v32  ;;  %1997 = vmatpush.bf16.msra.mxu1 %v2976_v40  ;;  %v2955_v32 = vld [vmem:[%s3569_s30 + $0x380] sm:$0xf] }
 0x295   : > { %v4286_v62 = vpop.f32.mrf.mxu2  ;;  %v1166_v49 = vpop.f32.mrf.mxu3  ;;  %2132 = vmatpush.bf16.msra.mxu2 %v3062_v56  ;;  %2156 = vmatpush.bf16.msra.mxu3 %v3066_v48 }
 0x296   : > { %v4290_v55 = vadd.f32 %v1166_v49, %v1019_v46  ;;  %v1335_v9 = vpop.f32.mrf.mxu1  ;;  %v3243_v49 = vld [vmem:[%s3569_s30 + $0x384] sm:$0xf0] }
 0x297   : > { %v4296_v50 = vadd.f32 %v1335_v9, %v4187_v2  ;;  %v2968_v2 = vor.u32 %v3244_v15, %v2965_v43  ;;  %v2956_v20 = vor.u32 %v3243_v49, %v2955_v32 }
 0x298   : > { %v477_v36 = vpop.xlane.xlu2 %476  ;;  %1974 = vmatpush.bf16.msrb.mxu0 %v2964_v4 }
 0x299   : > { %3361 = vrcp.f32 %v477_v36  ;;  %1998 = vmatpush.bf16.msra.mxu1 %v2968_v2  ;;  %2133 = vmatpush.bf16.msra.mxu2 %v3054_v34 }
 0x29a   : > { %2157 = vmatpush.bf16.msra.mxu3 %v3058_v42 }
 0x29c   : > { %1975 = vmatpush.bf16.msrb.mxu0 %v2956_v20 }
 0x29d   : > { %v1145_v54 = vpop.f32.mrf.mxu2  ;;  %v1169_v24 = vpop.f32.mrf.mxu3 }
 0x29e   : > { %v4311_v8 = vadd.f32 %v1145_v54, %v4140_v61  ;;  %v4314_v46 = vadd.f32 %v1169_v24, %v4232_v30  ;;  %v1337_v59 = vpop.f32.mrf.mxu1  ;;  %1823 = vmatmul.bf16.gmra.mxu2 %v4030_v52  ;;  %1847 = vmatmul.bf16.gmra.mxu3 %v4030_v52  ;;  %v2960_v61 = vor.u32 %v3242_v18, %v2957_v27 }
 0x29f   : > { %v3362_v40 = vpop.eup %3361  ;;  %v1353_v56 = vadd.f32 %v1337_v59, %v4218_v19  ;;  %v1566_v19 = vsel %vm1211_vm5, %v1563_v5, %v1565_v37  ;;  %v716_v5 = vpop.permute.xlu0 %715 }
 0x2a0   : > { %v495_v9 = vmul.f32 0.16666667, %v3362_v40  ;;  %1999 = vmatpush.bf16.msra.mxu1 %v2960_v61 }
 0x2a2   : > { %v4332_v52 = vmul.f32 %v4047_v31, %v495_v9 }
 0x2a3   : > { %1665 = vmatmul.bf16.gmra.mxu0 %v1566_v19  ;;  %1689 = vmatmul.bf16.gmra.mxu1 %v1566_v19 }
 0x2a4   : > { %v557_v45 = vsel %vm4327_vm4, %v4332_v52, 0.0  ;;  %v3024_v53 = vpack.c.bf16 %v4332_v52, %v4184_v17 }
 0x2a5   : > { %v674_v14 = vrot.slane %v557_v45, 1  ;;  %v4342_v15 = vpop.f32.mrf.mxu2  ;;  %v1171_v31 = vpop.f32.mrf.mxu3  ;;  %v583_v43 = vrot.slane %v557_v45, 7 }
 0x2a6   : > { %v4344_v38 = vadd.f32 %v1171_v31, %v1024_v47  ;;  %v1340_v60 = vpop.f32.mrf.mxu1  ;;  %v1184_v61 = vadd.f32 %v4342_v15, %v1000_v7 }
 0x2a7   : > { %v1355_v25 = vadd.f32 %v1340_v60, %v4259_v26  ;;  %v584_v33 = vsel %vm567_vm6, %v581_v12, %v583_v43  ;;  %v675_v1 = vsel %vm658_vm9, %v672_v6, %v674_v14  ;;  %vm3017_vm6 = vmpackc.low %vm3851_vm2, %vm3805_vm14  ;;  %v685_v3 = vsel %vm658_vm9, %v674_v14, 0.0  ;;  %v720_v35 = vpop.permute.xlu0 %719 }
 0x2a8   : > { %v657_v36 = vmul.f32 %v647_v10, %v584_v33  ;;  %v729_v48 = vmul.f32 %v716_v5, %v675_v1  ;;  %vm3020_vm14 = vmpackc.low %vm3989_vm12, %vm3874_vm7 }
 0x2a9   : > { %vm3023_vm2 = vmpackc.low %vm4327_vm4, %vm4179_vm0 }
 0x2aa   : > { %v1540_v4 = vpack.c.bf16 %v729_v48, %v729_v48  ;;  %v1712_v2 = vpack.c.bf16 %v657_v36, %v4212_v44 }
 0x2ac   : > { %v1567_v12 = vrot.slane %v1540_v4, 2 }
 0x2ad   : > { %v1486_v34 = vpop.f32.mrf.mxu2  ;;  %v1510_v16 = vpop.f32.mrf.mxu3 }
 0x2ae   : > { %v4355_v0 = vadd.f32 %v1486_v34, %v4160_v39  ;;  %v4358_v26 = vadd.f32 %v1510_v16, %v4296_v50  ;;  %1828 = vmatmul.bf16.gmra.mxu2 %v1712_v2  ;;  %1852 = vmatmul.bf16.gmra.mxu3 %v1712_v2  ;;  %v1568_v57 = vsel %vm1211_vm5, %v1565_v37, %v1567_v12  ;;  %v1342_v32 = vpop.f32.mrf.mxu1 }
 0x2af   : > { %v995_v37 = vadd.f32 %v4113_v51, %v4087_v41  ;;  %v1357_v18 = vadd.f32 %v1342_v32, %v4290_v55 }
 0x2b1   : > { %v1180_v49 = vadd.f32 %v4286_v62, %v995_v37 }
 0x2b3   : > { %1670 = vmatmul.bf16.gmra.mxu0 %v1568_v57  ;;  %1694 = vmatmul.bf16.gmra.mxu1 %v1568_v57 }
 0x2b5   : > { %v1488_v6 = vpop.f32.mrf.mxu2  ;;  %v1512_v42 = vpop.f32.mrf.mxu3 }
 0x2b6   : > { %v4362_v54 = vadd.f32 %v1488_v6, %v4195_v58  ;;  %v4364_v44 = vadd.f32 %v1512_v42, %v1353_v56  ;;  %v1318_v58 = vpop.f32.mrf.mxu0 }
 0x2bd   : > { %v1491_v24 = vpop.f32.mrf.mxu2  ;;  %v1515_v39 = vpop.f32.mrf.mxu3 }
 0x2be   : > { %v4367_v59 = vadd.f32 %v1491_v24, %v4271_v11  ;;  %v4369_v50 = vadd.f32 %v1515_v39, %v1355_v25  ;;  %2134 = vmatmul.bf16.vlgmr.msra.gmra.mxu2 %v4009_v28  ;;  %2158 = vmatmul.bf16.vlgmr.msra.gmra.mxu3 %v4009_v28  ;;  %v1356_v11 = vadd.f32 %v1318_v58, %v1180_v49 }
 0x2c3   : > { %3019 = vmatmul.msk.bf16.vlgmr.msrb.gmra.mxu0 %vm3017_vm6, %v3859_v13  ;;  %3028 = vmatmul.msk.bf16.vlgmr.msra.gmra.mxu1 %vm3017_vm6, %v3859_v13  ;;  %v730_v13 = vmul.f32 %v720_v35, %v685_v3 }
 0x2c5   : > { %v1493_v28 = vpop.f32.mrf.mxu2  ;;  %v1517_v40 = vpop.f32.mrf.mxu3  ;;  %v2028_v51 = vpack.c.bf16 %v730_v13, %v729_v48 }
 0x2c6   : > { %v4383_v56 = vadd.f32 %v1493_v28, %v1356_v11  ;;  %v4385_v41 = vadd.f32 %v1517_v40, %v1357_v18 }
 0x2ce   : > { %2139 = vmatmul.bf16.gmra.mxu2 %v4303_v21  ;;  %2163 = vmatmul.bf16.gmra.mxu3 %v4303_v21 }
 0x2d3   : > { %3022 = vmatmul.msk.bf16.gmra.mxu0 %vm3020_vm14, %v4007_v22  ;;  %3031 = vmatmul.msk.bf16.gmra.mxu1 %vm3020_vm14, %v4007_v22 }
 0x2de   : > { %2144 = vmatmul.bf16.gmra.mxu2 %v2028_v51  ;;  %2168 = vmatmul.bf16.gmra.mxu3 %v2028_v51 }
 0x2e3   : > { %3025 = vmatmul.msk.bf16.gmra.mxu0 %vm3023_vm2, %v3024_v53  ;;  %3034 = vmatmul.msk.bf16.gmra.mxu1 %vm3023_vm2, %v3024_v53 }
 0x300   : > { %v1321_v23 = vpop.f32.mrf.mxu0  ;;  %v1345_v62 = vpop.f32.mrf.mxu1 }
 0x301   : > { %v1358_v22 = vadd.f32 %v1321_v23, %v4311_v8  ;;  %v1359_v55 = vadd.f32 %v1345_v62, %v4314_v46  ;;  %v1496_v21 = vpop.f32.mrf.mxu2  ;;  %v1520_v20 = vpop.f32.mrf.mxu3 }
 0x303   : > { %v4404_v27 = vadd.f32 %v1496_v21, %v1358_v22  ;;  %v4406_v9 = vadd.f32 %v1520_v20, %v1359_v55 }
 0x308   : > { %v1323_v17 = vpop.f32.mrf.mxu0  ;;  %v1347_v30 = vpop.f32.mrf.mxu1 }
 0x309   : > { %v1360_v52 = vadd.f32 %v1323_v17, %v1184_v61  ;;  %v1361_v19 = vadd.f32 %v1347_v30, %v4344_v38  ;;  %v1498_v47 = vpop.f32.mrf.mxu2  ;;  %v1522_v8 = vpop.f32.mrf.mxu3 }
 0x30b   : > { %v4412_v45 = vadd.f32 %v1498_v47, %v1360_v52  ;;  %v4414_v46 = vadd.f32 %v1522_v8, %v1361_v19 }
 0x310   : > { %v1661_v10 = vpop.f32.mrf.mxu0  ;;  %v1685_v14 = vpop.f32.mrf.mxu1 }
 0x311   : > { %v1819_v31 = vpop.f32.mrf.mxu2  ;;  %v1843_v43 = vpop.f32.mrf.mxu3  ;;  %v1700_v39 = vadd.f32 %v1661_v10, %v4355_v0  ;;  %v1701_v37 = vadd.f32 %v1685_v14, %v4358_v26 }
 0x313   : > { %v1858_v58 = vadd.f32 %v1819_v31, %v1700_v39  ;;  %v1859_v32 = vadd.f32 %v1843_v43, %v1701_v37 }
 0x318   : > { %v1663_v60 = vpop.f32.mrf.mxu0  ;;  %v1687_v63 = vpop.f32.mrf.mxu1 }
 0x319   : > { %v1821_v29 = vpop.f32.mrf.mxu2  ;;  %v1845_v15 = vpop.f32.mrf.mxu3  ;;  %v1702_v0 = vadd.f32 %v1663_v60, %v4362_v54  ;;  %v1703_v26 = vadd.f32 %v1687_v63, %v4364_v44 }
 0x31b   : > { %v1860_v51 = vadd.f32 %v1821_v29, %v1702_v0  ;;  %v1861_v53 = vadd.f32 %v1845_v15, %v1703_v26 }
 0x320   : > { %v1666_v5 = vpop.f32.mrf.mxu0  ;;  %v1690_v25 = vpop.f32.mrf.mxu1 }
 0x321   : > { %v1824_v33 = vpop.f32.mrf.mxu2  ;;  %v1848_v38 = vpop.f32.mrf.mxu3  ;;  %v1704_v7 = vadd.f32 %v1666_v5, %v4367_v59  ;;  %v1705_v54 = vadd.f32 %v1690_v25, %v4369_v50 }
 0x323   : > { %v1862_v17 = vadd.f32 %v1824_v33, %v1704_v7  ;;  %v1863_v30 = vadd.f32 %v1848_v38, %v1705_v54 }
 0x328   : > { %v1668_v1 = vpop.f32.mrf.mxu0  ;;  %v1692_v36 = vpop.f32.mrf.mxu1 }
 0x329   : > { %v1826_v48 = vpop.f32.mrf.mxu2  ;;  %v1850_v4 = vpop.f32.mrf.mxu3  ;;  %v1706_v31 = vadd.f32 %v1668_v1, %v4383_v56  ;;  %v1707_v59 = vadd.f32 %v1692_v36, %v4385_v41 }
 0x32b   : > { %v1864_v60 = vadd.f32 %v1826_v48, %v1706_v31  ;;  %v1865_v63 = vadd.f32 %v1850_v4, %v1707_v59 }
 0x330   : > { %v4417_v2 = vpop.f32.mrf.mxu0  ;;  %v4419_v34 = vpop.f32.mrf.mxu1 }
 0x331   : > { %v4421_v16 = vpop.f32.mrf.mxu2  ;;  %v4423_v12 = vpop.f32.mrf.mxu3  ;;  %v1708_v39 = vadd.f32 %v4417_v2, %v4404_v27  ;;  %v1709_v56 = vadd.f32 %v4419_v34, %v4406_v9 }
 0x333   : > { %v1866_v36 = vadd.f32 %v4421_v16, %v1708_v39  ;;  %v1867_v48 = vadd.f32 %v4423_v12, %v1709_v56 }
 0x338   : > { %v4425_v57 = vpop.f32.mrf.mxu0  ;;  %v4427_v6 = vpop.f32.mrf.mxu1 }
 0x339   : > { %v4430_v42 = vpop.f32.mrf.mxu2  ;;  %v4432_v24 = vpop.f32.mrf.mxu3  ;;  %v1710_v27 = vadd.f32 %v4425_v57, %v4412_v45  ;;  %v1711_v9 = vadd.f32 %v4427_v6, %v4414_v46 }
 0x33b   : > { %v1868_v16 = vadd.f32 %v4430_v42, %v1710_v27  ;;  %v1869_v12 = vadd.f32 %v4432_v24, %v1711_v9 }
 0x340   : > { %v1977_v49 = vpop.f32.mrf.mxu0  ;;  %v2001_v11 = vpop.f32.mrf.mxu1 }
 0x341   : > { %v2016_v18 = vadd.f32 %v1977_v49, %v1858_v58  ;;  %v2017_v28 = vadd.f32 %v2001_v11, %v1859_v32  ;;  %v2135_v40 = vpop.f32.mrf.mxu2  ;;  %v2159_v3 = vpop.f32.mrf.mxu3 }
 0x343   : > { %v2174_v35 = vadd.f32 %v2135_v40, %v2016_v18  ;;  %v2175_v13 = vadd.f32 %v2159_v3, %v2017_v28 }
 0x345   : > { %2186 = vst [vmem:[%s4439_s27] sm:$0xff] %v2174_v35 }
 0x346   : > { %2187 = vst [vmem:[%s4439_s27 + $0x8] sm:$0xff] %v2175_v13 }
 0x348   : > { %v1979_v23 = vpop.f32.mrf.mxu0  ;;  %v2003_v62 = vpop.f32.mrf.mxu1 }
 0x349   : > { %v2018_v22 = vadd.f32 %v1979_v23, %v1860_v51  ;;  %v2019_v55 = vadd.f32 %v2003_v62, %v1861_v53  ;;  %v2137_v21 = vpop.f32.mrf.mxu2  ;;  %v2161_v20 = vpop.f32.mrf.mxu3 }
 0x34b   : > { %v2176_v61 = vadd.f32 %v2137_v21, %v2018_v22  ;;  %v2177_v44 = vadd.f32 %v2161_v20, %v2019_v55 }
 0x34d   : > { %2188 = vst [vmem:[%s4439_s27 + $0x10] sm:$0xff] %v2176_v61 }
 0x34e   : > { %2189 = vst [vmem:[%s4439_s27 + $0x18] sm:$0xff] %v2177_v44 }
 0x350   : > { %v1982_v52 = vpop.f32.mrf.mxu0  ;;  %v2006_v19 = vpop.f32.mrf.mxu1 }
 0x351   : > { %v2020_v47 = vadd.f32 %v1982_v52, %v1862_v17  ;;  %v2021_v8 = vadd.f32 %v2006_v19, %v1863_v30  ;;  %v2140_v10 = vpop.f32.mrf.mxu2  ;;  %v2164_v14 = vpop.f32.mrf.mxu3 }
 0x353   : > { %v2178_v43 = vadd.f32 %v2140_v10, %v2020_v47  ;;  %v2179_v50 = vadd.f32 %v2164_v14, %v2021_v8 }
 0x355   : > { %2190 = vst [vmem:[%s4439_s27 + $0x20] sm:$0xff] %v2178_v43 }
 0x356   : > { %2191 = vst [vmem:[%s4439_s27 + $0x28] sm:$0xff] %v2179_v50 }
 0x358   : > { %v1984_v29 = vpop.f32.mrf.mxu0  ;;  %v2008_v15 = vpop.f32.mrf.mxu1 }
 0x359   : > { %v2022_v5 = vadd.f32 %v1984_v29, %v1864_v60  ;;  %v2023_v25 = vadd.f32 %v2008_v15, %v1865_v63  ;;  %v2142_v33 = vpop.f32.mrf.mxu2  ;;  %v2166_v38 = vpop.f32.mrf.mxu3 }
 0x35b   : > { %v2180_v41 = vadd.f32 %v2142_v33, %v2022_v5  ;;  %v2181_v1 = vadd.f32 %v2166_v38, %v2023_v25 }
 0x35d   : > { %2192 = vst [vmem:[%s4439_s27 + $0x30] sm:$0xff] %v2180_v41 }
 0x35e   : > { %2193 = vst [vmem:[%s4439_s27 + $0x38] sm:$0xff] %v2181_v1 }
 0x360   : > { %v1987_v4 = vpop.f32.mrf.mxu0  ;;  %v2011_v37 = vpop.f32.mrf.mxu1 }
 0x361   : > { %v2024_v58 = vadd.f32 %v1987_v4, %v1866_v36  ;;  %v2025_v32 = vadd.f32 %v2011_v37, %v1867_v48  ;;  %v2145_v49 = vpop.f32.mrf.mxu2  ;;  %v2169_v11 = vpop.f32.mrf.mxu3 }
 0x363   : > { %v2182_v2 = vadd.f32 %v2145_v49, %v2024_v58  ;;  %v2183_v34 = vadd.f32 %v2169_v11, %v2025_v32 }
 0x365   : > { %2194 = vst [vmem:[%s4439_s27 + $0x40] sm:$0xff] %v2182_v2 }
 0x366   : > { %2195 = vst [vmem:[%s4439_s27 + $0x48] sm:$0xff] %v2183_v34 }
 0x368   : > { %v1989_v18 = vpop.f32.mrf.mxu0  ;;  %v2013_v28 = vpop.f32.mrf.mxu1 }
 0x369   : > { %v2026_v40 = vadd.f32 %v1989_v18, %v1868_v16  ;;  %v2027_v3 = vadd.f32 %v2013_v28, %v1869_v12  ;;  %v2147_v0 = vpop.f32.mrf.mxu2  ;;  %v2171_v26 = vpop.f32.mrf.mxu3 }
 0x36b   : > { %v2184_v45 = vadd.f32 %v2147_v0, %v2026_v40  ;;  %v2185_v57 = vadd.f32 %v2171_v26, %v2027_v3 }
 0x36d   : > { %2196 = vst [vmem:[%s4439_s27 + $0x50] sm:$0xff] %v2184_v45 }
 0x36e   : > { %2197 = vst [vmem:[%s4439_s27 + $0x58] sm:$0xff] %v2185_v57 }
 0x36f PF: > { %s14_s19 = sadd.s32 1, %s3401_s19   ;;  %s4509_s15 = smov %s3393_s17 }
 0x370   : > { %p11_p9 = scmp.ge.s32.totalorder %s14_s19, 8   ;;  %s4510_s16 = smov %s3397_s18 }
 0x371   : > { %s4511_s17 = smov %s4514_s20  ;;  %s4512_s18 = smov %s4518_s21 }
 0x372   :  { %13 = sbr.rel (!%p11_p9) target bundleno = 3 (0x3), region = 81 }

</bundles_post_ra>
